<compile_context>
chip_gen: v6e
topology: v6e:2x2x1
jax: 0.10.0
libtpu: 0.0.40
codegen_flags: <defaults>
</compile_context>

<pallas_src>
import functools
import math

import numpy as np
import jax
import jax.numpy as jnp
from jax import lax
from jax.experimental import pallas as pl
from jax.experimental.pallas import tpu as pltpu

BN_EPS = 1e-5
# Eval-mode BatchNorm with the module's init (gamma=1, beta=0, mean=0, var=1)
# reduces to a per-channel scale of 1/sqrt(1+eps); the scale is folded into
# the weight columns and a (zero) per-channel bias rides in the epilogue so
# the fusion stays valid for real trained checkpoints.
BN_SCALE = 1.0 / math.sqrt(1.0 + BN_EPS)
NUM_GROUPS = 40
VMEM_LIMIT = 32 * 1024 * 1024          # leave headroom on v7x (64 MiB / TC)


def _rup(x, m):
    return (x + m - 1) // m * m


def _choose_tile(n, target=8):
    # tile must divide n exactly so output blocks are exactly in-bounds
    if n <= target or n % target != 0:
        return n
    return target


# ---------------------------------------------------------------------------
# Pallas kernel 1: implicit-GEMM stride-1 convolution (2-D and 3-D unified,
# arbitrary static tap list), fused (bias, +residual, ReLU) epilogue.
# Activations are channels-last, W-major: (B, D, W, H, C)  (D = 1 for 2-D).
# ---------------------------------------------------------------------------
def _tap_conv_kernel(*refs, taps, n_do, tr, s_out, cin, cout, slab_rows,
                     relu, has_res):
    if has_res:
        x_hbm, w_ref, bias_ref, r_ref, o_ref, slab, sem = refs
    else:
        x_hbm, w_ref, bias_ref, o_ref, slab, sem = refs
        r_ref = None
    b = pl.program_id(0)
    t = pl.program_id(1)
    # Halo slab: all padded D planes, TR + halo rows along W, full padded H,
    # all channels.  One DMA per grid step; all taps below reuse it.
    cp = pltpu.make_async_copy(
        x_hbm.at[b, :, pl.ds(t * tr, slab_rows), :, :], slab, sem)
    cp.start()
    cp.wait()
    bias = bias_ref[...].astype(jnp.float32)                 # (1, Cout)

    by_dz = {}
    for i, (dz, dr, ds) in enumerate(taps):
        by_dz.setdefault(dz, []).append((i, dr, ds))

    def body(do, carry):
        acc = jnp.zeros((tr * s_out, cout), jnp.float32)
        for dz, tap_list in by_dz.items():
            plane = slab[do + dz]                            # (slab_rows, Sp, C)
            for (i, dr, ds) in tap_list:
                win = plane[dr:dr + tr, ds:ds + s_out, :].reshape(
                    tr * s_out, cin)
                acc = acc + jnp.dot(win, w_ref[i * cin:(i + 1) * cin, :],
                                    preferred_element_type=jnp.float32)
        out = acc + bias
        if has_res:
            out = out + r_ref[do].reshape(tr * s_out, cout).astype(jnp.float32)
        if relu:
            out = jnp.maximum(out, 0.0)
        o_ref[do] = out.reshape(tr, s_out, cout).astype(o_ref.dtype)
        return carry

    lax.fori_loop(0, n_do, body, 0)


@functools.partial(jax.jit,
                   static_argnames=("taps", "do_", "ro", "so", "relu",
                                    "out_dtype"))
def _tap_conv(xp, w_mat, bias, residual, *, taps, do_, ro, so, relu,
              out_dtype):
    """xp: (B, Dp, Rp, Sp, C) pre-padded bf16.  Returns (B, do_, ro, so, Cout)."""
    B, Dp, Rp, Sp, C = xp.shape
    cout = w_mat.shape[1]
    kr = max(t[1] for t in taps) + 1
    TR = _choose_tile(ro)
    nT = ro // TR
    slab_rows = TR + kr - 1
    has_res = residual is not None

    in_specs = [pl.BlockSpec(memory_space=pl.ANY),
                pl.BlockSpec((len(taps) * C, cout), lambda b, t: (0, 0)),
                pl.BlockSpec((1, cout), lambda b, t: (0, 0))]
    inputs = [xp, w_mat, bias]
    if has_res:
        in_specs.append(pl.BlockSpec((None, do_, TR, so, cout),
                                     lambda b, t: (b, 0, t, 0, 0)))
        inputs.append(residual)

    return pl.pallas_call(
        functools.partial(_tap_conv_kernel, taps=taps, n_do=do_, tr=TR,
                          s_out=so, cin=C, cout=cout, slab_rows=slab_rows,
                          relu=relu, has_res=has_res),
        out_shape=jax.ShapeDtypeStruct((B, do_, ro, so, cout), out_dtype),
        grid_spec=pltpu.PrefetchScalarGridSpec(
            num_scalar_prefetch=0,
            grid=(B, nT),
            in_specs=in_specs,
            out_specs=pl.BlockSpec((None, do_, TR, so, cout),
                                   lambda b, t: (b, 0, t, 0, 0)),
            scratch_shapes=[pltpu.VMEM((Dp, slab_rows, Sp, C), jnp.bfloat16),
                            pltpu.SemaphoreType.DMA]),
        compiler_params=pltpu.CompilerParams(
            dimension_semantics=("parallel", "parallel"),
            vmem_limit_bytes=VMEM_LIMIT),
    )(*inputs)


# ---------------------------------------------------------------------------
# Stride-1 conv wrappers (build taps + scaled weight matrix, no im2col).
# ---------------------------------------------------------------------------
@functools.partial(jax.jit,
                   static_argnames=("dilation", "bn", "relu", "out_dtype"))
def conv2d_s1(x, w, residual=None, *, dilation=1, bn=True, relu=False,
              out_dtype=jnp.bfloat16):
    # x: (B, W, H, C); w: (Cout, Cin, kh, kw) torch layout; stride 1.
    B, W, H, C = x.shape
    cout, cin, kh, kw = w.shape
    dil = dilation
    pad = dil * (kh - 1) // 2
    taps = tuple((0, dxi * dil, dyi * dil)
                 for dyi in range(kh) for dxi in range(kw))
    scale = BN_SCALE if bn else 1.0
    w_mat = (jnp.transpose(w, (2, 3, 1, 0)).reshape(kh * kw * cin, cout)
             * scale).astype(jnp.bfloat16)
    bias = jnp.zeros((1, cout), jnp.float32)   # TODO(synk): real BN beta path
    xp = jnp.pad(x.astype(jnp.bfloat16),
                 ((0, 0), (pad, pad), (pad, pad), (0, 0)))[:, None]
    res = None if residual is None else residual[:, None]
    out = _tap_conv(xp, w_mat, bias, res, taps=taps, do_=1, ro=W, so=H,
                    relu=relu, out_dtype=out_dtype)
    return out[:, 0]


@functools.partial(jax.jit, static_argnames=("bn", "relu", "out_dtype"))
def conv3d_s1(x, w, residual=None, *, bn=True, relu=False,
              out_dtype=jnp.bfloat16):
    # x: (B, D, W, H, C); w: (Cout, Cin, kd, kh, kw) torch layout; stride 1.
    B, D, W, H, C = x.shape
    cout, cin, kd, kh, kw = w.shape
    pad = (kd - 1) // 2
    taps = tuple((dzi, dxi, dyi)
                 for dzi in range(kd) for dyi in range(kh)
                 for dxi in range(kw))
    scale = BN_SCALE if bn else 1.0
    w_mat = (jnp.transpose(w, (2, 3, 4, 1, 0)).reshape(kd * kh * kw * cin,
                                                       cout)
             * scale).astype(jnp.bfloat16)
    bias = jnp.zeros((1, cout), jnp.float32)
    xp = jnp.pad(x.astype(jnp.bfloat16),
                 ((0, 0), (pad, pad), (pad, pad), (pad, pad), (0, 0)))
    return _tap_conv(xp, w_mat, bias, residual, taps=taps, do_=D, ro=W, so=H,
                     relu=relu, out_dtype=out_dtype)


# ---------------------------------------------------------------------------
# Pallas kernel 2: tiled matmul with fused ReLU -- used only for the few
# stride-2 convolutions (bounded im2col) and the small upsample matmuls.
# ---------------------------------------------------------------------------
def _mm_kernel(a_ref, b_ref, o_ref, acc_ref, *, nsteps, relu):
    @pl.when(pl.program_id(2) == 0)
    def _():
        acc_ref[...] = jnp.zeros_like(acc_ref)

    acc_ref[...] += jnp.dot(a_ref[...], b_ref[...],
                            preferred_element_type=jnp.float32)

    @pl.when(pl.program_id(2) == nsteps - 1)
    def _():
        r = acc_ref[...]
        if relu:
            r = jnp.maximum(r, 0.0)
        o_ref[...] = r.astype(o_ref.dtype)


@functools.partial(jax.jit, static_argnames=("relu", "out_dtype"))
def pallas_matmul(a, b, *, relu=False, out_dtype=jnp.bfloat16):
    M, K = a.shape
    K2, N = b.shape
    assert K == K2
    TM = min(512, _rup(M, 8))
    TN = N if N <= 1024 else 256          # full last dim -> no N padding
    TK = min(1024, _rup(K, 128))
    Mp, Np, Kp = _rup(M, TM), _rup(N, TN), _rup(K, TK)
    a_p = a.astype(jnp.bfloat16)
    if (Mp, Kp) != (M, K):
        a_p = jnp.pad(a_p, ((0, Mp - M), (0, Kp - K)))
    b_p = b.astype(jnp.bfloat16)
    if (Kp, Np) != (K, N):
        b_p = jnp.pad(b_p, ((0, Kp - K), (0, Np - N)))
    nsteps = Kp // TK
    out = pl.pallas_call(
        functools.partial(_mm_kernel, nsteps=nsteps, relu=relu),
        out_shape=jax.ShapeDtypeStruct((Mp, Np), out_dtype),
        grid_spec=pltpu.PrefetchScalarGridSpec(
            num_scalar_prefetch=0,
            grid=(Mp // TM, Np // TN, nsteps),
            in_specs=[pl.BlockSpec((TM, TK), lambda i, j, k: (i, k)),
                      pl.BlockSpec((TK, TN), lambda i, j, k: (k, j))],
            out_specs=pl.BlockSpec((TM, TN), lambda i, j, k: (i, j)),
            scratch_shapes=[pltpu.VMEM((TM, TN), jnp.float32)]),
        compiler_params=pltpu.CompilerParams(
            dimension_semantics=("parallel", "parallel", "arbitrary"),
            vmem_limit_bytes=VMEM_LIMIT),
    )(a_p, b_p)
    if (Mp, Np) != (M, N):
        out = out[:M, :N]
    return out


# Stride-2 convs: bounded im2col (output voxels are 1/4 or 1/8 of the input,
# so the patch matrix is <= 2.25x / 3.4x the input).
# TODO(synk): fold these into the implicit-GEMM kernel via input phase-split.
@functools.partial(jax.jit, static_argnames=("relu",))
def conv2d_s2(x, w, *, relu=False):
    # 3x3, stride 2, pad 1 (the only stride-2 2-D convs in GwcNet)
    B, W, H, C = x.shape
    cout, cin, _, _ = w.shape
    xp = jnp.pad(x.astype(jnp.bfloat16), ((0, 0), (1, 1), (1, 1), (0, 0)))
    Wo = (W - 1) // 2 + 1
    Ho = (H - 1) // 2 + 1
    cols = []
    for dyi in range(3):           # kh index <-> H axis
        for dxi in range(3):       # kw index <-> W axis
            cols.append(xp[:, dxi:dxi + (Wo - 1) * 2 + 1:2,
                           dyi:dyi + (Ho - 1) * 2 + 1:2, :])
    patches = jnp.concatenate(cols, -1).reshape(B * Wo * Ho, 9 * C)
    w_mat = (jnp.transpose(w, (2, 3, 1, 0)).reshape(9 * cin, cout)
             * BN_SCALE).astype(jnp.bfloat16)
    out = pallas_matmul(patches, w_mat, relu=relu, out_dtype=jnp.bfloat16)
    return out.reshape(B, Wo, Ho, cout)


@functools.partial(jax.jit, static_argnames=("relu",))
def conv3d_s2(x, w, *, relu=False):
    # 3x3x3, stride 2, pad 1
    B, D, W, H, C = x.shape
    cout, cin, _, _, _ = w.shape
    xp = jnp.pad(x.astype(jnp.bfloat16),
                 ((0, 0), (1, 1), (1, 1), (1, 1), (0, 0)))
    Do = (D - 1) // 2 + 1
    Wo = (W - 1) // 2 + 1
    Ho = (H - 1) // 2 + 1
    cols = []
    for dzi in range(3):
        for dyi in range(3):       # kh <-> H
            for dxi in range(3):   # kw <-> W
                cols.append(xp[:, dzi:dzi + (Do - 1) * 2 + 1:2,
                               dxi:dxi + (Wo - 1) * 2 + 1:2,
                               dyi:dyi + (Ho - 1) * 2 + 1:2, :])
    patches = jnp.concatenate(cols, -1).reshape(B * Do * Wo * Ho, 27 * C)
    w_mat = (jnp.transpose(w, (2, 3, 4, 1, 0)).reshape(27 * cin, cout)
             * BN_SCALE).astype(jnp.bfloat16)
    out = pallas_matmul(patches, w_mat, relu=relu, out_dtype=jnp.bfloat16)
    return out.reshape(B, Do, Wo, Ho, cout)


# Sub-pixel / phase-split ConvTranspose3d (k=3, stride=2, pad=1, out_pad=1):
# even output -> w[1]; odd -> w[2]@offset0 + w[0]@offset1.
_DECONV_TAPS = {0: ((0, 1),), 1: ((0, 2), (1, 0))}


@functools.partial(jax.jit, static_argnames=("relu",))
def conv_transpose3d(x, w, residual=None, *, relu=False):
    # x: (B, D, W, H, Cin); w: (Cin, Cout, 3, 3, 3) torch deconv layout.
    B, D, W, H, C = x.shape
    cin, cout = w.shape[0], w.shape[1]
    assert cin == C
    xpad = jnp.pad(x.astype(jnp.bfloat16),
                   ((0, 0), (0, 1), (0, 1), (0, 1), (0, 0)))
    bias = jnp.zeros((1, cout), jnp.float32)
    phase_outs = []
    for pd in (0, 1):
        for pr in (0, 1):          # W parity
            for ps in (0, 1):      # H parity
                taps, rows = [], []
                for (od, kd_) in _DECONV_TAPS[pd]:
                    for (orr, kw_) in _DECONV_TAPS[pr]:
                        for (osh, kh_) in _DECONV_TAPS[ps]:
                            taps.append((od, orr, osh))
                            rows.append(w[:, :, kd_, kh_, kw_])
                w_mat = (jnp.concatenate(rows, axis=0)
                         * BN_SCALE).astype(jnp.bfloat16)
                res_ph = None
                if residual is not None:
                    res_ph = residual[:, pd::2, pr::2, ps::2, :]
                o = _tap_conv(xpad, w_mat, bias, res_ph, taps=tuple(taps),
                              do_=D, ro=W, so=H, relu=relu,
                              out_dtype=jnp.bfloat16)
                phase_outs.append(o)
    # TODO(synk): write all phases from one pallas_call straight into the
    # interleaved (B,D,2,W,2,H,2,C) layout to remove this full-volume pass.
    y = jnp.stack(phase_outs, axis=0).reshape(2, 2, 2, B, D, W, H, cout)
    y = jnp.transpose(y, (3, 4, 0, 5, 1, 6, 2, 7))
    return y.reshape(B, 2 * D, 2 * W, 2 * H, cout)


# ---------------------------------------------------------------------------
# Pallas kernel 3: group-wise correlation cost volume.  Grid is
# (B, H-tiles, disparity) with disparity innermost/"arbitrary" so the left
# block and the full padded right block stay resident across all disparities.
# ---------------------------------------------------------------------------
def _gwc_kernel(l_ref, r_ref, avg_ref, o_ref, *, maxdisp, width, th):
    d = pl.program_id(2)
    l = l_ref[...]                                            # (W, TH, C) bf16
    r = r_ref[pl.ds(maxdisp - 1 - d, width), :, :]            # bf16
    prod = (l * r).reshape(width * th, l.shape[-1])
    corr = jnp.dot(prod, avg_ref[...], preferred_element_type=jnp.float32)
    o_ref[...] = corr.reshape(width, th, -1).astype(o_ref.dtype)


@functools.partial(jax.jit, static_argnames=("maxdisp", "num_groups"))
def build_gwc_volume(left_f, right_f, *, maxdisp, num_groups):
    # left_f / right_f: (B, Wq, Hq, C) W-major channels-last, bf16
    B, Wq, Hq, C = left_f.shape
    cpg = C // num_groups
    TH = 8 if Hq % 8 == 0 else Hq
    fl = left_f.astype(jnp.bfloat16)
    fr = jnp.pad(right_f.astype(jnp.bfloat16),
                 ((0, 0), (maxdisp - 1, 0), (0, 0), (0, 0)))
    avg = np.zeros((C, num_groups), np.float32)
    for g in range(num_groups):
        avg[g * cpg:(g + 1) * cpg, g] = 1.0 / cpg
    return pl.pallas_call(
        functools.partial(_gwc_kernel, maxdisp=maxdisp, width=Wq, th=TH),
        out_shape=jax.ShapeDtypeStruct((B, maxdisp, Wq, Hq, num_groups),
                                       jnp.bfloat16),
        grid_spec=pltpu.PrefetchScalarGridSpec(
            num_scalar_prefetch=0,
            grid=(B, Hq // TH, maxdisp),
            in_specs=[
                pl.BlockSpec((None, Wq, TH, C), lambda b, t, d: (b, 0, t, 0)),
                pl.BlockSpec((None, Wq + maxdisp - 1, TH, C),
                             lambda b, t, d: (b, 0, t, 0)),
                pl.BlockSpec((C, num_groups), lambda b, t, d: (0, 0))],
            out_specs=pl.BlockSpec((None, None, Wq, TH, num_groups),
                                   lambda b, t, d: (b, d, 0, t, 0))),
        compiler_params=pltpu.CompilerParams(
            dimension_semantics=("parallel", "parallel", "arbitrary"),
            vmem_limit_bytes=VMEM_LIMIT),
    )(fl, fr, jnp.asarray(avg, jnp.bfloat16))


# ---------------------------------------------------------------------------
# Pallas kernel 4: fused disparity-axis upsample + softmax + soft-argmax.
# ---------------------------------------------------------------------------
def _regress_kernel(u_ref, y_ref, o_ref):
    y = y_ref[...].astype(jnp.float32)                        # (Dqp, TC)
    c = jnp.dot(u_ref[...], y, preferred_element_type=jnp.float32)
    m = jnp.max(c, axis=0, keepdims=True)
    e = jnp.exp(c - m)
    s = jnp.sum(e, axis=0, keepdims=True)
    disp = lax.broadcasted_iota(jnp.float32, c.shape, 0)
    num = jnp.sum(e * disp, axis=0, keepdims=True)
    o_ref[...] = num * pl.reciprocal(s, approx=True)


def _interp_matrix(out_size, in_size):
    m = np.zeros((out_size, in_size), np.float32)
    if in_size == 1:
        m[:, 0] = 1.0
        return m
    scale = in_size / out_size
    for o in range(out_size):
        src = max((o + 0.5) * scale - 0.5, 0.0)
        i0 = min(int(math.floor(src)), in_size - 1)
        i1 = min(i0 + 1, in_size - 1)
        w1 = src - i0
        m[o, i0] += 1.0 - w1
        m[o, i1] += w1
    return m


@functools.partial(jax.jit, static_argnames=("maxdisp",))
def regression_fused(y, *, maxdisp):
    # y: (B, Dq, W, H) quarter-disparity cost (bf16), pixel order (W, H)
    B, Dq, W, H = y.shape
    HW = W * H
    TC = 256
    HWp = _rup(HW, TC)
    Dqp = _rup(Dq, 8)
    u_np = np.zeros((maxdisp, Dqp), np.float32)
    u_np[:, :Dq] = _interp_matrix(maxdisp, Dq)
    y3 = jnp.pad(y.reshape(B, Dq, HW),
                 ((0, 0), (0, Dqp - Dq), (0, HWp - HW)))
    out = pl.pallas_call(
        _regress_kernel,
        out_shape=jax.ShapeDtypeStruct((B, 1, HWp), jnp.float32),
        grid_spec=pltpu.PrefetchScalarGridSpec(
            num_scalar_prefetch=0,
            grid=(B, HWp // TC),
            in_specs=[pl.BlockSpec((maxdisp, Dqp), lambda b, t: (0, 0)),
                      pl.BlockSpec((None, Dqp, TC), lambda b, t: (b, 0, t))],
            out_specs=pl.BlockSpec((None, 1, TC), lambda b, t: (b, 0, t))),
        compiler_params=pltpu.CompilerParams(
            dimension_semantics=("parallel", "parallel"),
            vmem_limit_bytes=VMEM_LIMIT),
    )(jnp.asarray(u_np), y3)
    return out[:, 0, :HW].reshape(B, W, H)


def upsample_last(x, out_size):
    """Linear (align_corners=False) upsample along the last axis via matmul."""
    lead, n = x.shape[:-1], x.shape[-1]
    wm = jnp.asarray(_interp_matrix(out_size, n).T, jnp.bfloat16)   # (n, out)
    out = pallas_matmul(x.reshape(-1, n), wm, out_dtype=jnp.bfloat16)
    return out.reshape(lead + (out_size,))


# ---------------------------------------------------------------------------
# Parameter construction (deterministic, synthetic, PyTorch weight layouts).
# ---------------------------------------------------------------------------
class _Rng:
    def __init__(self, seed):
        self._key = jax.random.PRNGKey(seed)

    def next(self):
        self._key, sub = jax.random.split(self._key)
        return sub


def c2w(rng, cout, cin, k):
    n = k * k * cout
    return jax.random.normal(rng.next(), (cout, cin, k, k),
                             jnp.float32) * math.sqrt(2.0 / n)


def c3w(rng, cout, cin, k):
    n = k * k * k * cout
    return jax.random.normal(rng.next(), (cout, cin, k, k, k),
                             jnp.float32) * math.sqrt(2.0 / n)


def d3w(rng, cin, cout, k):
    n = k * k * k * cout
    return jax.random.normal(rng.next(), (cin, cout, k, k, k),
                             jnp.float32) * math.sqrt(2.0 / n)


def make_layer(rng, inplanes, planes, blocks, stride):
    params = []
    down = None
    if stride != 1 or inplanes != planes:
        down = c2w(rng, planes, inplanes, 1)
    params.append({"conv1": c2w(rng, planes, inplanes, 3),
                   "conv2": c2w(rng, planes, planes, 3),
                   "down": down})
    for _ in range(1, blocks):
        params.append({"conv1": c2w(rng, planes, planes, 3),
                       "conv2": c2w(rng, planes, planes, 3),
                       "down": None})
    return params


def make_hourglass(rng, c):
    return {"conv1": c3w(rng, 2 * c, c, 3), "conv2": c3w(rng, 2 * c, 2 * c, 3),
            "conv3": c3w(rng, 4 * c, 2 * c, 3),
            "conv4": c3w(rng, 4 * c, 4 * c, 3),
            "conv5": d3w(rng, 4 * c, 2 * c, 3),
            "conv6": d3w(rng, 2 * c, c, 3),
            "redir1": c3w(rng, c, c, 1), "redir2": c3w(rng, 2 * c, 2 * c, 1)}


def build_params(seed=0):
    rng = _Rng(seed)
    feat = {"first": [c2w(rng, 32, 3, 3), c2w(rng, 32, 32, 3),
                      c2w(rng, 32, 32, 3)],
            "layer1": make_layer(rng, 32, 32, 3, 1),
            "layer2": make_layer(rng, 32, 64, 16, 2),
            "layer3": make_layer(rng, 64, 128, 3, 1),
            "layer4": make_layer(rng, 128, 128, 3, 1)}
    return {"feat": feat,
            "dres0": [c3w(rng, 32, NUM_GROUPS, 3), c3w(rng, 32, 32, 3)],
            "dres1": [c3w(rng, 32, 32, 3), c3w(rng, 32, 32, 3)],
            "dres2": make_hourglass(rng, 32),
            "dres3": make_hourglass(rng, 32),
            "dres4": make_hourglass(rng, 32),
            "classif3": [c3w(rng, 32, 32, 3), c3w(rng, 1, 32, 3)]}


# ---------------------------------------------------------------------------
# Model forward (eval mode, use_concat_volume=False).
# Activations are channels-last, W-major: (B, W, H, C) / (B, D, W, H, C).
# ---------------------------------------------------------------------------
def basic_block(x, p, *, stride, dilation):
    if stride == 1:
        out = conv2d_s1(x, p["conv1"], dilation=dilation, relu=True)
    else:
        out = conv2d_s2(x, p["conv1"], relu=True)
    if p["down"] is not None:
        xi = x[:, ::stride, ::stride, :] if stride != 1 else x
        identity = conv2d_s1(xi, p["down"], relu=False)        # 1x1 + BN
    else:
        identity = x
    # second convbn + residual add fused in the epilogue (no final ReLU).
    return conv2d_s1(out, p["conv2"], identity, dilation=dilation, relu=False)


def run_layer(x, blocks_p, *, stride, dilation):
    x = basic_block(x, blocks_p[0], stride=stride, dilation=dilation)
    for bp in blocks_p[1:]:
        x = basic_block(x, bp, stride=1, dilation=dilation)
    return x


def feature_extraction_fwd(x, p):
    x = conv2d_s2(x, p["first"][0], relu=True)
    x = conv2d_s1(x, p["first"][1], relu=True)
    x = conv2d_s1(x, p["first"][2], relu=True)
    x = run_layer(x, p["layer1"], stride=1, dilation=1)
    l2 = run_layer(x, p["layer2"], stride=2, dilation=1)
    l3 = run_layer(l2, p["layer3"], stride=1, dilation=1)
    l4 = run_layer(l3, p["layer4"], stride=1, dilation=2)
    return jnp.concatenate([l2, l3, l4], axis=-1)              # 320 channels


def hourglass_fwd(x, p):
    c1 = conv3d_s2(x, p["conv1"], relu=True)
    c2 = conv3d_s1(c1, p["conv2"], relu=True)
    c3 = conv3d_s2(c2, p["conv3"], relu=True)
    c4 = conv3d_s1(c3, p["conv4"], relu=True)
    r2 = conv3d_s1(c2, p["redir2"], relu=False)
    c5 = conv_transpose3d(c4, p["conv5"], r2, relu=True)       # fused +BN+res+ReLU
    r1 = conv3d_s1(x, p["redir1"], relu=False)
    c6 = conv_transpose3d(c5, p["conv6"], r1, relu=True)
    return c6


def gwcnet_forward(params, left, right, maxdisp):
    B, _, H, W = left.shape
    # single layout change at the boundary: NCHW -> W-major channels-last.
    xl = jnp.transpose(left, (0, 3, 2, 1))                     # (B, W, H, 3)
    xr = jnp.transpose(right, (0, 3, 2, 1))
    fl = feature_extraction_fwd(xl, params["feat"])            # (B, W/4, H/4, 320)
    fr = feature_extraction_fwd(xr, params["feat"])
    volume = build_gwc_volume(fl, fr, maxdisp=maxdisp // 4,
                              num_groups=NUM_GROUPS)           # (B, D/4, Wq, Hq, 40)

    # TODO(synk): SS superpixel branch (pretrained SpixelNet) + FeatureAtt
    # attention have no provided source; they are skipped.

    cost0 = conv3d_s1(volume, params["dres0"][0], relu=True)
    cost0 = conv3d_s1(cost0, params["dres0"][1], relu=True)
    d1 = conv3d_s1(cost0, params["dres1"][0], relu=True)
    cost0 = conv3d_s1(d1, params["dres1"][1], cost0, relu=False)   # skip fused
    out1 = hourglass_fwd(cost0, params["dres2"])
    out2 = hourglass_fwd(out1, params["dres3"])
    out3 = hourglass_fwd(out2, params["dres4"])

    c3 = conv3d_s1(out3, params["classif3"][0], relu=True)
    c3 = conv3d_s1(c3, params["classif3"][1], bn=False, relu=False,
                   out_dtype=jnp.float32)
    c3 = jnp.squeeze(c3, axis=-1)                              # (B, Dq, Wq, Hq)

    # Trilinear upsample (align_corners=False): H axis via Pallas matmul,
    # W axis via a left-side contraction (no full-volume transpose), disparity
    # axis fused into the regression kernel.
    Wq = c3.shape[2]
    c3 = upsample_last(c3, H)                                  # (B, Dq, Wq, H) bf16
    wmat_w = jnp.asarray(_interp_matrix(W, Wq), jnp.bfloat16)  # (W, Wq)
    # TODO(synk): this batched contraction is left to XLA (MXU einsum).
    c3 = jnp.einsum('vw,bdwh->bdvh', wmat_w, c3)               # (B, Dq, W, H)

    # TODO(synk): Regression(max_disparity, top_k=6) source not provided;
    # using the standard full-softmax soft-argmax disparity regression.
    pred = regression_fused(c3, maxdisp=maxdisp)               # (B, W, H)
    pred3 = jnp.transpose(pred, (0, 2, 1))                     # (B, H, W)
    return [pred3]


# ---------------------------------------------------------------------------
if __name__ == "__main__":
    maxdisp = 16                 # must be divisible by 4
    B, H, W = 2, 32, 32          # H, W divisible by 16 (hourglass shape match)

    key = jax.random.PRNGKey(0)
    kl, kr = jax.random.split(key)
    left = jax.random.normal(kl, (B, 3, H, W), jnp.float32)
    right = jax.random.normal(kr, (B, 3, H, W), jnp.float32)

    params = build_params(seed=0)
    preds = gwcnet_forward(params, left, right, maxdisp)
    pred3 = jax.block_until_ready(preds[0])
    assert pred3.shape == (B, H, W), pred3.shape
    assert bool(jnp.all(jnp.isfinite(pred3)))
    print("KERNEL_OK")
</pallas_src>

<mosaic_0001>
module attributes {stable_mosaic.version = 11 : i64} {
  func.func @_mm_kernel(%arg0: i32, %arg1: i32, %arg2: i32, %arg3: memref<512x128xbf16, #tpu.memory_space<vmem>>, %arg4: memref<128x32xbf16, #tpu.memory_space<vmem>>, %arg5: memref<512x32xbf16, #tpu.memory_space<vmem>>, %arg6: memref<512x32xf32, #tpu.memory_space<vmem>>) attributes {dimension_semantics = [#tpu.dimension_semantics<parallel>, #tpu.dimension_semantics<parallel>, #tpu.dimension_semantics<arbitrary>], iteration_bounds = array<i64: 1, 1, 1>, scalar_prefetch = 0 : i64, scratch_operands = 1 : i64, tpu.core_type = #tpu.core_type<tc>, window_params = [{transform_indices = @transform_0, window_bounds = array<i64: 512, 128>}, {transform_indices = @transform_1, window_bounds = array<i64: 128, 32>}, {transform_indices = @transform_2, window_bounds = array<i64: 512, 32>}]} {
    %c0_i32 = arith.constant 0 : i32
    %0 = arith.cmpi eq, %arg2, %c0_i32 : i32
    %1 = arith.extui %0 : i1 to i32
    %c0_i32_0 = arith.constant 0 : i32
    %2 = arith.cmpi ne, %1, %c0_i32_0 : i32
    scf.if %2 {
      %cst_10 = arith.constant 0.000000e+00 : f32
      %12 = vector.broadcast %cst_10 : f32 to vector<512x32xf32>
      %c0_11 = arith.constant 0 : index
      %c0_12 = arith.constant 0 : index
      %13 = vector.load %arg6[%c0_11, %c0_12] : memref<512x32xf32, #tpu.memory_space<vmem>>, vector<512x32xf32>
      tpu.vector_store %arg6[%c0_11, %c0_12], %12 {strides = array<i32>} : memref<512x32xf32, #tpu.memory_space<vmem>>, vector<512x32xf32>,
    } else {
    }
    %c0 = arith.constant 0 : index
    %c0_1 = arith.constant 0 : index
    %3 = vector.load %arg6[%c0, %c0_1] : memref<512x32xf32, #tpu.memory_space<vmem>>, vector<512x32xf32>
    %c0_2 = arith.constant 0 : index
    %c0_3 = arith.constant 0 : index
    %4 = vector.load %arg3[%c0_2, %c0_3] : memref<512x128xbf16, #tpu.memory_space<vmem>>, vector<512x128xbf16>
    %c0_4 = arith.constant 0 : index
    %c0_5 = arith.constant 0 : index
    %5 = vector.load %arg4[%c0_4, %c0_5] : memref<128x32xbf16, #tpu.memory_space<vmem>>, vector<128x32xbf16>
    %cst = arith.constant dense<0.000000e+00> : vector<512x32xf32>
    %6 = tpu.matmul %4, %5, %cst {dimension_numbers = #tpu.dot_dimension_numbers<[1], [0], [0], [1], [0, 0, 1, 1], [], []>} : vector<512x128xbf16>, vector<128x32xbf16>, vector<512x32xf32> -> vector<512x32xf32>
    %7 = arith.addf %3, %6 : vector<512x32xf32>
    %c0_6 = arith.constant 0 : index
    %c0_7 = arith.constant 0 : index
    %8 = vector.load %arg6[%c0_6, %c0_7] : memref<512x32xf32, #tpu.memory_space<vmem>>, vector<512x32xf32>
    tpu.vector_store %arg6[%c0_6, %c0_7], %7 {strides = array<i32>} : memref<512x32xf32, #tpu.memory_space<vmem>>, vector<512x32xf32>,
    %c0_i32_8 = arith.constant 0 : i32
    %9 = arith.cmpi eq, %arg2, %c0_i32_8 : i32
    %10 = arith.extui %9 : i1 to i32
    %c0_i32_9 = arith.constant 0 : i32
    %11 = arith.cmpi ne, %10, %c0_i32_9 : i32
    scf.if %11 {
      %c0_10 = arith.constant 0 : index
      %c0_11 = arith.constant 0 : index
      %12 = vector.load %arg6[%c0_10, %c0_11] : memref<512x32xf32, #tpu.memory_space<vmem>>, vector<512x32xf32>
      %cst_12 = arith.constant 0.000000e+00 : f32
      %13 = vector.broadcast %cst_12 : f32 to vector<512x32xf32>
      %14 = arith.maximumf %12, %13 : vector<512x32xf32>
      %15 = arith.truncf %14 : vector<512x32xf32> to vector<512x32xbf16>
      %c0_13 = arith.constant 0 : index
      %c0_14 = arith.constant 0 : index
      %16 = vector.load %arg5[%c0_13, %c0_14] : memref<512x32xbf16, #tpu.memory_space<vmem>>, vector<512x32xbf16>
      tpu.vector_store %arg5[%c0_13, %c0_14], %15 {strides = array<i32>} : memref<512x32xbf16, #tpu.memory_space<vmem>>, vector<512x32xbf16>,
    } else {
    }
    return
  }
  func.func @transform_0(%arg0: i32, %arg1: i32, %arg2: i32) -> (i32, i32) {
    %c0_i32 = arith.constant 0 : i32
    return %arg0, %arg2 : i32, i32
  }
  func.func @transform_1(%arg0: i32, %arg1: i32, %arg2: i32) -> (i32, i32) {
    %c0_i32 = arith.constant 0 : i32
    return %arg2, %arg1 : i32, i32
  }
  func.func @transform_2(%arg0: i32, %arg1: i32, %arg2: i32) -> (i32, i32) {
    %c0_i32 = arith.constant 0 : i32
    return %arg0, %arg1 : i32, i32
  }
}

</mosaic_0001>

<bundles_post_ra>
// kernel: pallas_matmul.1
= control target key start
LH: loop header
LB: loop body
LE: loop exit
PB: predicated region body
PF: predicated region fallthrough
CT: control target
= control target key end

     0   :  { %vm16_vm0 = vcmask 261120   ;;  %v1684_v1 = vmov 0.0   ;;  %vm1270_vm1 = vcmask 257024   ;;  %s2274_s1 = inlined_call_operand.vmem [shape: bf16[128,32], index: 1, kind: input, shape index: {}]   ;;  %s2275_s0 = inlined_call_operand.vmem [shape: bf16[512,128], index: 0, kind: input, shape index: {}]   ;;  %s2276_s2 = inlined_call_operand.vmem [shape: bf16[512,32], index: 2, kind: output, shape index: {}]  }
   0x1   :  { %v1703_v0 = vld [vmem:[%s2274_s1 + $0x38] sm:$0xff]   ;;  %19 = vst.msk [vmem:[#allocation2 + $0x10] sm:$0xff] %vm16_vm0, %v1684_v1  ;;  %17 = vst.msk [vmem:[#allocation2] sm:$0xff] %vm16_vm0, %v1684_v1  ;;  %v1645_v2 = vld [vmem:[%s2274_s1 + $0x30] sm:$0xff]  }
   0x2   :  { %18 = vst.msk [vmem:[#allocation2 + $0x8] sm:$0xff] %vm16_vm0, %v1684_v1  ;;  %20 = vst.msk [vmem:[#allocation2 + $0x18] sm:$0xff] %vm16_vm0, %v1684_v1  ;;  %1547 = vmatprep.subr.bf16.mxu0 %v1703_v0  ;;  %1627 = vmatprep.subr.bf16.mxu1 %v1703_v0  ;;  %v1646_v3 = vld [vmem:[%s2274_s1 + $0x28] sm:$0xff]   ;;  %v1647_v4 = vld [vmem:[%s2274_s1 + $0x20] sm:$0xff]  }
   0x3   :  { %21 = vst.msk [vmem:[#allocation2 + $0x20] sm:$0xff] %vm16_vm0, %v1684_v1  ;;  %22 = vst.msk [vmem:[#allocation2 + $0x28] sm:$0xff] %vm16_vm0, %v1684_v1  ;;  %1548 = vmatpush3.bf16.msra.mxu0 %v1703_v0  ;;  %1635 = vmatpush3.bf16.msra.mxu1 %v1703_v0  ;;  %v1652_v5 = vld [vmem:[%s2275_s0] sm:$0xff]   ;;  %v1648_v7 = vld [vmem:[%s2274_s1 + $0x18] sm:$0xff]  }
   0x4   :  { %23 = vst.msk [vmem:[#allocation2 + $0x30] sm:$0xff] %vm16_vm0, %v1684_v1  ;;  %24 = vst.msk [vmem:[#allocation2 + $0x38] sm:$0xff] %vm16_vm0, %v1684_v1  ;;  %1549 = vmatprep.subr.bf16.mxu0 %v1645_v2  ;;  %1628 = vmatprep.subr.bf16.mxu1 %v1645_v2  ;;  %v1653_v6 = vld [vmem:[%s2275_s0 + $0x80] sm:$0xff]   ;;  %v1649_v8 = vld [vmem:[%s2274_s1 + $0x10] sm:$0xff]  }
   0x5   :  { %25 = vst.msk [vmem:[#allocation2 + $0x40] sm:$0xff] %vm16_vm0, %v1684_v1  ;;  %26 = vst.msk [vmem:[#allocation2 + $0x48] sm:$0xff] %vm16_vm0, %v1684_v1  ;;  %1563 = vmatprep.mubr.bf16.mxu0 %v1652_v5  ;;  %1595 = vmatprep.mubr.bf16.mxu1 %v1653_v6  ;;  %v1650_v9 = vld [vmem:[%s2274_s1 + $0x8] sm:$0xff]   ;;  %v1651_v10 = vld [vmem:[%s2274_s1] sm:$0xff]  }
   0x6   :  { %27 = vst.msk [vmem:[#allocation2 + $0x50] sm:$0xff] %vm16_vm0, %v1684_v1  ;;  %28 = vst.msk [vmem:[#allocation2 + $0x58] sm:$0xff] %vm16_vm0, %v1684_v1  ;;  %v1654_v11 = vld [vmem:[%s2275_s0 + $0x8] sm:$0xff]   ;;  %v1656_v13 = vld [vmem:[%s2275_s0 + $0x10] sm:$0xff]  }
   0x7   :  { %29 = vst.msk [vmem:[#allocation2 + $0x60] sm:$0xff] %vm16_vm0, %v1684_v1  ;;  %30 = vst.msk [vmem:[#allocation2 + $0x68] sm:$0xff] %vm16_vm0, %v1684_v1  ;;  %1550 = vmatpush3.bf16.msra.mxu0 %v1645_v2  ;;  %1636 = vmatpush3.bf16.msra.mxu1 %v1645_v2  ;;  %v1655_v12 = vld [vmem:[%s2275_s0 + $0x88] sm:$0xff]   ;;  %v1657_v14 = vld [vmem:[%s2275_s0 + $0x90] sm:$0xff]  }
   0x8   :  { %31 = vst.msk [vmem:[#allocation2 + $0x70] sm:$0xff] %vm16_vm0, %v1684_v1  ;;  %32 = vst.msk [vmem:[#allocation2 + $0x78] sm:$0xff] %vm16_vm0, %v1684_v1  ;;  %1551 = vmatprep.subr.bf16.mxu0 %v1646_v3  ;;  %1629 = vmatprep.subr.bf16.mxu1 %v1646_v3  ;;  %v1658_v15 = vld [vmem:[%s2275_s0 + $0x18] sm:$0xff]   ;;  %v1660_v17 = vld [vmem:[%s2275_s0 + $0x20] sm:$0xff]  }
   0x9   :  { %33 = vst.msk [vmem:[#allocation2 + $0x80] sm:$0xff] %vm16_vm0, %v1684_v1  ;;  %34 = vst.msk [vmem:[#allocation2 + $0x88] sm:$0xff] %vm16_vm0, %v1684_v1  ;;  %v1659_v16 = vld [vmem:[%s2275_s0 + $0x98] sm:$0xff]   ;;  %v1661_v18 = vld [vmem:[%s2275_s0 + $0xa0] sm:$0xff]  }
   0xa   :  { %35 = vst.msk [vmem:[#allocation2 + $0x90] sm:$0xff] %vm16_vm0, %v1684_v1  ;;  %36 = vst.msk [vmem:[#allocation2 + $0x98] sm:$0xff] %vm16_vm0, %v1684_v1  ;;  %v1662_v19 = vld [vmem:[%s2275_s0 + $0x28] sm:$0xff]   ;;  %v1664_v21 = vld [vmem:[%s2275_s0 + $0x30] sm:$0xff]  }
   0xb   :  { %37 = vst.msk [vmem:[#allocation2 + $0xa0] sm:$0xff] %vm16_vm0, %v1684_v1  ;;  %38 = vst.msk [vmem:[#allocation2 + $0xa8] sm:$0xff] %vm16_vm0, %v1684_v1  ;;  %1552 = vmatpush3.bf16.msra.mxu0 %v1646_v3  ;;  %1637 = vmatpush3.bf16.msra.mxu1 %v1646_v3  ;;  %v1663_v20 = vld [vmem:[%s2275_s0 + $0xa8] sm:$0xff]   ;;  %v1665_v22 = vld [vmem:[%s2275_s0 + $0xb0] sm:$0xff]  }
   0xc   :  { %39 = vst.msk [vmem:[#allocation2 + $0xb0] sm:$0xff] %vm16_vm0, %v1684_v1  ;;  %40 = vst.msk [vmem:[#allocation2 + $0xb8] sm:$0xff] %vm16_vm0, %v1684_v1  ;;  %1553 = vmatprep.subr.bf16.mxu0 %v1647_v4  ;;  %1630 = vmatprep.subr.bf16.mxu1 %v1647_v4  ;;  %v1666_v23 = vld [vmem:[%s2275_s0 + $0x38] sm:$0xff]   ;;  %v1668_v25 = vld [vmem:[%s2275_s0 + $0x40] sm:$0xff]  }
   0xd   :  { %41 = vst.msk [vmem:[#allocation2 + $0xc0] sm:$0xff] %vm16_vm0, %v1684_v1  ;;  %42 = vst.msk [vmem:[#allocation2 + $0xc8] sm:$0xff] %vm16_vm0, %v1684_v1  ;;  %v1667_v24 = vld [vmem:[%s2275_s0 + $0xb8] sm:$0xff]   ;;  %v1669_v26 = vld [vmem:[%s2275_s0 + $0xc0] sm:$0xff]  }
   0xe   :  { %43 = vst.msk [vmem:[#allocation2 + $0xd0] sm:$0xff] %vm16_vm0, %v1684_v1  ;;  %44 = vst.msk [vmem:[#allocation2 + $0xd8] sm:$0xff] %vm16_vm0, %v1684_v1  ;;  %v1670_v27 = vld [vmem:[%s2275_s0 + $0x48] sm:$0xff]   ;;  %v1672_v29 = vld [vmem:[%s2275_s0 + $0x50] sm:$0xff]  }
   0xf   :  { %45 = vst.msk [vmem:[#allocation2 + $0xe0] sm:$0xff] %vm16_vm0, %v1684_v1  ;;  %46 = vst.msk [vmem:[#allocation2 + $0xe8] sm:$0xff] %vm16_vm0, %v1684_v1  ;;  %1554 = vmatpush3.bf16.msra.mxu0 %v1647_v4  ;;  %1638 = vmatpush3.bf16.msra.mxu1 %v1647_v4  ;;  %v1671_v28 = vld [vmem:[%s2275_s0 + $0xc8] sm:$0xff]   ;;  %v1673_v30 = vld [vmem:[%s2275_s0 + $0xd0] sm:$0xff]  }
  0x10   :  { %47 = vst.msk [vmem:[#allocation2 + $0xf0] sm:$0xff] %vm16_vm0, %v1684_v1  ;;  %48 = vst.msk [vmem:[#allocation2 + $0xf8] sm:$0xff] %vm16_vm0, %v1684_v1  ;;  %1555 = vmatprep.subr.bf16.mxu0 %v1648_v7  ;;  %1631 = vmatprep.subr.bf16.mxu1 %v1648_v7  ;;  %v1674_v31 = vld [vmem:[%s2275_s0 + $0x58] sm:$0xff]   ;;  %v1676_v33 = vld [vmem:[%s2275_s0 + $0x60] sm:$0xff]  }
  0x11   :  { %49 = vst.msk [vmem:[#allocation2 + $0x100] sm:$0xff] %vm16_vm0, %v1684_v1  ;;  %50 = vst.msk [vmem:[#allocation2 + $0x108] sm:$0xff] %vm16_vm0, %v1684_v1  ;;  %v1675_v32 = vld [vmem:[%s2275_s0 + $0xd8] sm:$0xff]   ;;  %v1677_v34 = vld [vmem:[%s2275_s0 + $0xe0] sm:$0xff]  }
  0x12   :  { %51 = vst.msk [vmem:[#allocation2 + $0x110] sm:$0xff] %vm16_vm0, %v1684_v1  ;;  %52 = vst.msk [vmem:[#allocation2 + $0x118] sm:$0xff] %vm16_vm0, %v1684_v1  ;;  %v1678_v35 = vld [vmem:[%s2275_s0 + $0x68] sm:$0xff]   ;;  %v1680_v37 = vld [vmem:[%s2275_s0 + $0x70] sm:$0xff]  }
  0x13   :  { %53 = vst.msk [vmem:[#allocation2 + $0x120] sm:$0xff] %vm16_vm0, %v1684_v1  ;;  %54 = vst.msk [vmem:[#allocation2 + $0x128] sm:$0xff] %vm16_vm0, %v1684_v1  ;;  %1556 = vmatpush3.bf16.msra.mxu0 %v1648_v7  ;;  %1639 = vmatpush3.bf16.msra.mxu1 %v1648_v7  ;;  %v1679_v36 = vld [vmem:[%s2275_s0 + $0xe8] sm:$0xff]   ;;  %v1681_v38 = vld [vmem:[%s2275_s0 + $0xf0] sm:$0xff]  }
  0x14   :  { %55 = vst.msk [vmem:[#allocation2 + $0x130] sm:$0xff] %vm16_vm0, %v1684_v1  ;;  %56 = vst.msk [vmem:[#allocation2 + $0x138] sm:$0xff] %vm16_vm0, %v1684_v1  ;;  %1557 = vmatprep.subr.bf16.mxu0 %v1649_v8  ;;  %1632 = vmatprep.subr.bf16.mxu1 %v1649_v8  ;;  %v1682_v39 = vld [vmem:[%s2275_s0 + $0x78] sm:$0xff]   ;;  %v83_v41 = vld [vmem:[#allocation2 + $0x10] sm:$0xff] }
  0x15   :  { %57 = vst.msk [vmem:[#allocation2 + $0x140] sm:$0xff] %vm16_vm0, %v1684_v1  ;;  %58 = vst.msk [vmem:[#allocation2 + $0x148] sm:$0xff] %vm16_vm0, %v1684_v1  ;;  %v1683_v40 = vld [vmem:[%s2275_s0 + $0xf8] sm:$0xff]   ;;  %v81_v45 = vld [vmem:[#allocation2] sm:$0xff] }
  0x16   :  { %59 = vst.msk [vmem:[#allocation2 + $0x150] sm:$0xff] %vm16_vm0, %v1684_v1  ;;  %60 = vst.msk [vmem:[#allocation2 + $0x158] sm:$0xff] %vm16_vm0, %v1684_v1  ;;  %v84_v51 = vld [vmem:[#allocation2 + $0x18] sm:$0xff]  ;;  %v82_v57 = vld [vmem:[#allocation2 + $0x8] sm:$0xff] }
  0x17   :  { %61 = vst.msk [vmem:[#allocation2 + $0x160] sm:$0xff] %vm16_vm0, %v1684_v1  ;;  %62 = vst.msk [vmem:[#allocation2 + $0x168] sm:$0xff] %vm16_vm0, %v1684_v1  ;;  %1558 = vmatpush3.bf16.msra.mxu0 %v1649_v8  ;;  %1640 = vmatpush3.bf16.msra.mxu1 %v1649_v8  ;;  %v87_v63 = vld [vmem:[#allocation2 + $0x30] sm:$0xff]  ;;  %v85_v5 = vld [vmem:[#allocation2 + $0x20] sm:$0xff] }
  0x18   :  { %63 = vst.msk [vmem:[#allocation2 + $0x170] sm:$0xff] %vm16_vm0, %v1684_v1  ;;  %64 = vst.msk [vmem:[#allocation2 + $0x178] sm:$0xff] %vm16_vm0, %v1684_v1  ;;  %1559 = vmatprep.subr.bf16.mxu0 %v1650_v9  ;;  %1633 = vmatprep.subr.bf16.mxu1 %v1650_v9  ;;  %v113_v46 = vld [vmem:[#allocation2 + $0x100] sm:$0xff]  ;;  %v114_v58 = vld [vmem:[#allocation2 + $0x108] sm:$0xff] }
  0x19   :  { %65 = vst.msk [vmem:[#allocation2 + $0x180] sm:$0xff] %vm16_vm0, %v1684_v1  ;;  %66 = vst.msk [vmem:[#allocation2 + $0x188] sm:$0xff] %vm16_vm0, %v1684_v1  ;;  %v115_v42 = vld [vmem:[#allocation2 + $0x110] sm:$0xff]  ;;  %v116_v52 = vld [vmem:[#allocation2 + $0x118] sm:$0xff] }
  0x1a   :  { %67 = vst.msk [vmem:[#allocation2 + $0x190] sm:$0xff] %vm16_vm0, %v1684_v1  ;;  %68 = vst.msk [vmem:[#allocation2 + $0x198] sm:$0xff] %vm16_vm0, %v1684_v1  ;;  %v117_v6 = vld [vmem:[#allocation2 + $0x120] sm:$0xff] }
  0x1b   :  { %69 = vst.msk [vmem:[#allocation2 + $0x1a0] sm:$0xff] %vm16_vm0, %v1684_v1  ;;  %70 = vst.msk [vmem:[#allocation2 + $0x1a8] sm:$0xff] %vm16_vm0, %v1684_v1  ;;  %1560 = vmatpush3.bf16.msra.mxu0 %v1650_v9  ;;  %1641 = vmatpush3.bf16.msra.mxu1 %v1650_v9  ;;  %v119_v0 = vld [vmem:[#allocation2 + $0x130] sm:$0xff] }
  0x1c   :  { %71 = vst.msk [vmem:[#allocation2 + $0x1b0] sm:$0xff] %vm16_vm0, %v1684_v1  ;;  %72 = vst.msk [vmem:[#allocation2 + $0x1b8] sm:$0xff] %vm16_vm0, %v1684_v1  ;;  %1561 = vmatprep.subr.bf16.mxu0 %v1651_v10  ;;  %1634 = vmatprep.subr.bf16.mxu1 %v1651_v10 }
  0x1d   :  { %73 = vst.msk [vmem:[#allocation2 + $0x1c0] sm:$0xff] %vm16_vm0, %v1684_v1  ;;  %74 = vst.msk [vmem:[#allocation2 + $0x1c8] sm:$0xff] %vm16_vm0, %v1684_v1 }
  0x1e   :  { %75 = vst.msk [vmem:[#allocation2 + $0x1d0] sm:$0xff] %vm16_vm0, %v1684_v1  ;;  %76 = vst.msk [vmem:[#allocation2 + $0x1d8] sm:$0xff] %vm16_vm0, %v1684_v1 }
  0x1f   :  { %77 = vst.msk [vmem:[#allocation2 + $0x1e0] sm:$0xff] %vm16_vm0, %v1684_v1  ;;  %78 = vst.msk [vmem:[#allocation2 + $0x1e8] sm:$0xff] %vm16_vm0, %v1684_v1  ;;  %1562 = vmatpush3.bf16.msra.mxu0 %v1651_v10  ;;  %1642 = vmatpush3.bf16.msra.mxu1 %v1651_v10 }
  0x20   :  { %79 = vst.msk [vmem:[#allocation2 + $0x1f0] sm:$0xff] %vm16_vm0, %v1684_v1  ;;  %80 = vst.msk [vmem:[#allocation2 + $0x1f8] sm:$0xff] %vm16_vm0, %v1684_v1 }
  0x22   :  { %1564 = vmatmul.mubr.bf16.vlgmr.msra.gmra.mxu0 %v1654_v11  ;;  %1596 = vmatmul.mubr.bf16.vlgmr.msra.gmra.mxu1 %v1655_v12 }
  0x23   :  { %1567 = vmatprep.mubr.bf16.mxu0 %v1656_v13  ;;  %1599 = vmatprep.mubr.bf16.mxu1 %v1657_v14 }
  0x2a   :  { %1568 = vmatmul.mubr.bf16.gmra.mxu0 %v1658_v15  ;;  %1600 = vmatmul.mubr.bf16.gmra.mxu1 %v1659_v16 }
  0x2b   :  { %1571 = vmatprep.mubr.bf16.mxu0 %v1660_v17  ;;  %1603 = vmatprep.mubr.bf16.mxu1 %v1661_v18  ;;  %v88_v17 = vld [vmem:[#allocation2 + $0x38] sm:$0xff] }
  0x2c   :  { %v120_v18 = vld [vmem:[#allocation2 + $0x138] sm:$0xff] }
  0x32   :  { %1572 = vmatmul.mubr.bf16.gmra.mxu0 %v1662_v19  ;;  %1604 = vmatmul.mubr.bf16.gmra.mxu1 %v1663_v20 }
  0x33   :  { %1575 = vmatprep.mubr.bf16.mxu0 %v1664_v21  ;;  %1607 = vmatprep.mubr.bf16.mxu1 %v1665_v22 }
  0x3a   :  { %1576 = vmatmul.mubr.bf16.gmra.mxu0 %v1666_v23  ;;  %1608 = vmatmul.mubr.bf16.gmra.mxu1 %v1667_v24 }
  0x3b   :  { %1579 = vmatprep.mubr.bf16.mxu0 %v1668_v25  ;;  %1611 = vmatprep.mubr.bf16.mxu1 %v1669_v26 }
  0x42   :  { %1580 = vmatmul.mubr.bf16.gmra.mxu0 %v1670_v27  ;;  %1612 = vmatmul.mubr.bf16.gmra.mxu1 %v1671_v28  ;;  %v86_v27 = vld [vmem:[#allocation2 + $0x28] sm:$0xff] }
  0x43   :  { %1583 = vmatprep.mubr.bf16.mxu0 %v1672_v29  ;;  %1615 = vmatprep.mubr.bf16.mxu1 %v1673_v30  ;;  %v118_v28 = vld [vmem:[#allocation2 + $0x128] sm:$0xff] }
  0x4a   :  { %1584 = vmatmul.mubr.bf16.gmra.mxu0 %v1674_v31  ;;  %1616 = vmatmul.mubr.bf16.gmra.mxu1 %v1675_v32 }
  0x4b   :  { %1587 = vmatprep.mubr.bf16.mxu0 %v1676_v33  ;;  %1619 = vmatprep.mubr.bf16.mxu1 %v1677_v34 }
  0x52   :  { %1588 = vmatmul.mubr.bf16.gmra.mxu0 %v1678_v35  ;;  %1620 = vmatmul.mubr.bf16.gmra.mxu1 %v1679_v36 }
  0x53   :  { %1591 = vmatprep.mubr.bf16.mxu0 %v1680_v37  ;;  %1623 = vmatprep.mubr.bf16.mxu1 %v1681_v38 }
  0x5a   :  { %1592 = vmatmul.mubr.bf16.gmra.mxu0 %v1682_v39  ;;  %1624 = vmatmul.mubr.bf16.gmra.mxu1 %v1683_v40  ;;  %v91_v39 = vld [vmem:[#allocation2 + $0x50] sm:$0xff] }
  0x5b   :  { %v123_v40 = vld [vmem:[#allocation2 + $0x150] sm:$0xff] }
  0xe2   :  { %v1565_v43 = vpop.f32.mrf.mxu0  ;;  %v1597_v44 = vpop.f32.mrf.mxu1 }
  0xe3   :  { %v756_v47 = vadd.f32 %v1565_v43, %v83_v41  ;;  %v788_v48 = vadd.f32 %v1597_v44, %v115_v42 }
  0xe4   :  { %v499_v49 = vpop.f32.mrf.mxu0  ;;  %v627_v50 = vpop.f32.mrf.mxu1 }
  0xe5   :  { %821 = vst.msk [vmem:[#allocation2 + $0x10] sm:$0xff] %vm16_vm0, %v756_v47  ;;  %853 = vst.msk [vmem:[#allocation2 + $0x110] sm:$0xff] %vm16_vm0, %v788_v48  ;;  %v754_v53 = vadd.f32 %v499_v49, %v81_v45  ;;  %v786_v54 = vadd.f32 %v627_v50, %v113_v46 }
  0xe6   :  { %v1566_v55 = vpop.f32.mrf.mxu0  ;;  %v1598_v56 = vpop.f32.mrf.mxu1 }
  0xe7   :  { %819 = vst.msk [vmem:[#allocation2] sm:$0xff] %vm16_vm0, %v754_v53  ;;  %851 = vst.msk [vmem:[#allocation2 + $0x100] sm:$0xff] %vm16_vm0, %v786_v54  ;;  %v757_v59 = vadd.f32 %v1566_v55, %v84_v51  ;;  %v789_v60 = vadd.f32 %v1598_v56, %v116_v52  ;;  %v89_v51 = vld [vmem:[#allocation2 + $0x40] sm:$0xff] }
  0xe8   :  { %v502_v61 = vpop.f32.mrf.mxu0  ;;  %v630_v62 = vpop.f32.mrf.mxu1  ;;  %v121_v52 = vld [vmem:[#allocation2 + $0x140] sm:$0xff] }
  0xe9   :  { %822 = vst.msk [vmem:[#allocation2 + $0x18] sm:$0xff] %vm16_vm0, %v757_v59  ;;  %854 = vst.msk [vmem:[#allocation2 + $0x118] sm:$0xff] %vm16_vm0, %v789_v60  ;;  %v755_v1 = vadd.f32 %v502_v61, %v82_v57  ;;  %v787_v2 = vadd.f32 %v630_v62, %v114_v58 }
  0xea   :  { %v1569_v3 = vpop.f32.mrf.mxu0  ;;  %v1601_v4 = vpop.f32.mrf.mxu1 }
  0xeb   :  { %820 = vst.msk [vmem:[#allocation2 + $0x8] sm:$0xff] %vm16_vm0, %v755_v1  ;;  %852 = vst.msk [vmem:[#allocation2 + $0x108] sm:$0xff] %vm16_vm0, %v787_v2  ;;  %v760_v7 = vadd.f32 %v1569_v3, %v87_v63  ;;  %v792_v8 = vadd.f32 %v1601_v4, %v119_v0  ;;  %v92_v63 = vld [vmem:[#allocation2 + $0x58] sm:$0xff]  ;;  %v90_v1 = vld [vmem:[#allocation2 + $0x48] sm:$0xff] }
  0xec   :  { %v888_v9 = vld [vmem:[#allocation2 + $0x10] sm:$0xff]  ;;  %v515_v11 = vpop.f32.mrf.mxu0  ;;  %v643_v12 = vpop.f32.mrf.mxu1  ;;  %v124_v0 = vld [vmem:[#allocation2 + $0x158] sm:$0xff] }
  0xed   :  { %v920_v10 = vld [vmem:[#allocation2 + $0x110] sm:$0xff]  ;;  %v952_v13 = vmax.f32 %v888_v9, 0.0  ;;  %825 = vst.msk [vmem:[#allocation2 + $0x30] sm:$0xff] %vm16_vm0, %v760_v7  ;;  %857 = vst.msk [vmem:[#allocation2 + $0x130] sm:$0xff] %vm16_vm0, %v792_v8  ;;  %v758_v15 = vadd.f32 %v515_v11, %v85_v5  ;;  %v790_v16 = vadd.f32 %v643_v12, %v117_v6  ;;  %v122_v8 = vld [vmem:[#allocation2 + $0x148] sm:$0xff] }
  0xee   :  { %v984_v14 = vmax.f32 %v920_v10, 0.0  ;;  %v886_v19 = vld [vmem:[#allocation2] sm:$0xff]  ;;  %v1570_v21 = vpop.f32.mrf.mxu0  ;;  %v1602_v22 = vpop.f32.mrf.mxu1 }
  0xef   :  { %v918_v20 = vld [vmem:[#allocation2 + $0x100] sm:$0xff]  ;;  %v1445_v23 = vpack.c.bf16 %v952_v13, %v952_v13  ;;  %v950_v25 = vmax.f32 %v886_v19, 0.0  ;;  %823 = vst.msk [vmem:[#allocation2 + $0x20] sm:$0xff] %vm16_vm0, %v758_v15  ;;  %855 = vst.msk [vmem:[#allocation2 + $0x120] sm:$0xff] %vm16_vm0, %v790_v16  ;;  %v761_v31 = vadd.f32 %v1570_v21, %v88_v17  ;;  %v793_v32 = vadd.f32 %v1602_v22, %v120_v18  ;;  %v95_v17 = vld [vmem:[#allocation2 + $0x70] sm:$0xff] }
  0xf0   :  { %v1477_v24 = vpack.c.bf16 %v984_v14, %v984_v14  ;;  %v982_v26 = vmax.f32 %v918_v20, 0.0  ;;  %v889_v29 = vld [vmem:[#allocation2 + $0x18] sm:$0xff]  ;;  %v518_v33 = vpop.f32.mrf.mxu0  ;;  %v646_v34 = vpop.f32.mrf.mxu1  ;;  %v127_v18 = vld [vmem:[#allocation2 + $0x170] sm:$0xff] }
  0xf1   :  { %v921_v30 = vld [vmem:[#allocation2 + $0x118] sm:$0xff]  ;;  %1273 = vst.msk [vmem:[%s2276_s2 + $0x8] sm:$0xf] %vm1270_vm1, %v1445_v23  ;;  %v1443_v35 = vpack.c.bf16 %v950_v25, %v950_v25  ;;  %v953_v37 = vmax.f32 %v889_v29, 0.0  ;;  %v759_v43 = vadd.f32 %v518_v33, %v86_v27  ;;  %v791_v44 = vadd.f32 %v646_v34, %v118_v28  ;;  %v93_v29 = vld [vmem:[#allocation2 + $0x60] sm:$0xff] }
  0xf2   :  { %1305 = vst.msk [vmem:[%s2276_s2 + $0x88] sm:$0xf] %vm1270_vm1, %v1477_v24  ;;  %v1475_v36 = vpack.c.bf16 %v982_v26, %v982_v26  ;;  %v985_v38 = vmax.f32 %v921_v30, 0.0  ;;  %v887_v41 = vld [vmem:[#allocation2 + $0x8] sm:$0xff]  ;;  %v1573_v45 = vpop.f32.mrf.mxu0  ;;  %v1605_v46 = vpop.f32.mrf.mxu1  ;;  %v125_v30 = vld [vmem:[#allocation2 + $0x160] sm:$0xff] }
  0xf3   :  { %v919_v42 = vld [vmem:[#allocation2 + $0x108] sm:$0xff]  ;;  %826 = vst.msk [vmem:[#allocation2 + $0x38] sm:$0xff] %vm16_vm0, %v761_v31  ;;  %858 = vst.msk [vmem:[#allocation2 + $0x138] sm:$0xff] %vm16_vm0, %v793_v32  ;;  %v1446_v47 = vpack.c.bf16 %v953_v37, %v953_v37  ;;  %v951_v49 = vmax.f32 %v887_v41, 0.0  ;;  %v764_v55 = vadd.f32 %v1573_v45, %v91_v39  ;;  %v796_v56 = vadd.f32 %v1605_v46, %v123_v40  ;;  %v96_v41 = vld [vmem:[#allocation2 + $0x78] sm:$0xff] }
  0xf4   :  { %1271 = vst.msk [vmem:[%s2276_s2] sm:$0xf] %vm1270_vm1, %v1443_v35  ;;  %1303 = vst.msk [vmem:[%s2276_s2 + $0x80] sm:$0xf] %vm1270_vm1, %v1475_v36  ;;  %v1478_v48 = vpack.c.bf16 %v985_v38, %v985_v38  ;;  %v983_v50 = vmax.f32 %v919_v42, 0.0  ;;  %v892_v53 = vld [vmem:[#allocation2 + $0x30] sm:$0xff]  ;;  %v531_v57 = vpop.f32.mrf.mxu0  ;;  %v659_v58 = vpop.f32.mrf.mxu1 }
  0xf5   :  { %v924_v54 = vld [vmem:[#allocation2 + $0x130] sm:$0xff]  ;;  %824 = vst.msk [vmem:[#allocation2 + $0x28] sm:$0xff] %vm16_vm0, %v759_v43  ;;  %856 = vst.msk [vmem:[#allocation2 + $0x128] sm:$0xff] %vm16_vm0, %v791_v44  ;;  %v1444_v59 = vpack.c.bf16 %v951_v49, %v951_v49  ;;  %v956_v61 = vmax.f32 %v892_v53, 0.0  ;;  %v762_v4 = vadd.f32 %v531_v57, %v89_v51  ;;  %v794_v5 = vadd.f32 %v659_v58, %v121_v52  ;;  %v128_v42 = vld [vmem:[#allocation2 + $0x178] sm:$0xff] }
  0xf6   :  { %1274 = vst.msk [vmem:[%s2276_s2 + $0xc] sm:$0xf] %vm1270_vm1, %v1446_v47  ;;  %1306 = vst.msk [vmem:[%s2276_s2 + $0x8c] sm:$0xf] %vm1270_vm1, %v1478_v48  ;;  %v1476_v60 = vpack.c.bf16 %v983_v50, %v983_v50  ;;  %v988_v62 = vmax.f32 %v924_v54, 0.0  ;;  %v890_v2 = vld [vmem:[#allocation2 + $0x20] sm:$0xff]  ;;  %v1574_v6 = vpop.f32.mrf.mxu0  ;;  %v1606_v7 = vpop.f32.mrf.mxu1 }
  0xf7   :  { %v922_v3 = vld [vmem:[#allocation2 + $0x120] sm:$0xff]  ;;  %829 = vst.msk [vmem:[#allocation2 + $0x50] sm:$0xff] %vm16_vm0, %v764_v55  ;;  %861 = vst.msk [vmem:[#allocation2 + $0x150] sm:$0xff] %vm16_vm0, %v796_v56  ;;  %v1449_v9 = vpack.c.bf16 %v956_v61, %v956_v61  ;;  %v954_v11 = vmax.f32 %v890_v2, 0.0  ;;  %v765_v13 = vadd.f32 %v1574_v6, %v92_v63  ;;  %v797_v14 = vadd.f32 %v1606_v7, %v124_v0  ;;  %v94_v53 = vld [vmem:[#allocation2 + $0x68] sm:$0xff] }
  0xf8   :  { %1272 = vst.msk [vmem:[%s2276_s2 + $0x4] sm:$0xf] %vm1270_vm1, %v1444_v59  ;;  %1304 = vst.msk [vmem:[%s2276_s2 + $0x84] sm:$0xf] %vm1270_vm1, %v1476_v60  ;;  %v1481_v10 = vpack.c.bf16 %v988_v62, %v988_v62  ;;  %v986_v12 = vmax.f32 %v922_v3, 0.0  ;;  %v534_v15 = vpop.f32.mrf.mxu0  ;;  %v662_v16 = vpop.f32.mrf.mxu1  ;;  %v126_v54 = vld [vmem:[#allocation2 + $0x168] sm:$0xff] }
  0xf9   :  { %827 = vst.msk [vmem:[#allocation2 + $0x40] sm:$0xff] %vm16_vm0, %v762_v4  ;;  %859 = vst.msk [vmem:[#allocation2 + $0x140] sm:$0xff] %vm16_vm0, %v794_v5  ;;  %v1447_v19 = vpack.c.bf16 %v954_v11, %v954_v11  ;;  %v763_v23 = vadd.f32 %v534_v15, %v90_v1  ;;  %v795_v24 = vadd.f32 %v662_v16, %v122_v8  ;;  %v99_v1 = vld [vmem:[#allocation2 + $0x90] sm:$0xff] }
  0xfa   :  { %1277 = vst.msk [vmem:[%s2276_s2 + $0x18] sm:$0xf] %vm1270_vm1, %v1449_v9  ;;  %1309 = vst.msk [vmem:[%s2276_s2 + $0x98] sm:$0xf] %vm1270_vm1, %v1481_v10  ;;  %v1479_v20 = vpack.c.bf16 %v986_v12, %v986_v12  ;;  %v893_v21 = vld [vmem:[#allocation2 + $0x38] sm:$0xff]  ;;  %v1577_v27 = vpop.f32.mrf.mxu0  ;;  %v1609_v28 = vpop.f32.mrf.mxu1  ;;  %v131_v2 = vld [vmem:[#allocation2 + $0x190] sm:$0xff] }
  0xfb   :  { %v925_v22 = vld [vmem:[#allocation2 + $0x138] sm:$0xff]  ;;  %v957_v25 = vmax.f32 %v893_v21, 0.0  ;;  %830 = vst.msk [vmem:[#allocation2 + $0x58] sm:$0xff] %vm16_vm0, %v765_v13  ;;  %862 = vst.msk [vmem:[#allocation2 + $0x158] sm:$0xff] %vm16_vm0, %v797_v14  ;;  %v768_v33 = vadd.f32 %v1577_v27, %v95_v17  ;;  %v800_v34 = vadd.f32 %v1609_v28, %v127_v18 }
  0xfc   :  { %v989_v26 = vmax.f32 %v925_v22, 0.0  ;;  %1275 = vst.msk [vmem:[%s2276_s2 + $0x10] sm:$0xf] %vm1270_vm1, %v1447_v19  ;;  %1307 = vst.msk [vmem:[%s2276_s2 + $0x90] sm:$0xf] %vm1270_vm1, %v1479_v20  ;;  %v891_v31 = vld [vmem:[#allocation2 + $0x28] sm:$0xff]  ;;  %v547_v39 = vpop.f32.mrf.mxu0  ;;  %v675_v40 = vpop.f32.mrf.mxu1 }
  0xfd   :  { %v923_v32 = vld [vmem:[#allocation2 + $0x128] sm:$0xff]  ;;  %828 = vst.msk [vmem:[#allocation2 + $0x48] sm:$0xff] %vm16_vm0, %v763_v23  ;;  %860 = vst.msk [vmem:[#allocation2 + $0x148] sm:$0xff] %vm16_vm0, %v795_v24  ;;  %v1450_v35 = vpack.c.bf16 %v957_v25, %v957_v25  ;;  %v955_v37 = vmax.f32 %v891_v31, 0.0  ;;  %v766_v45 = vadd.f32 %v547_v39, %v93_v29  ;;  %v798_v46 = vadd.f32 %v675_v40, %v125_v30  ;;  %v97_v19 = vld [vmem:[#allocation2 + $0x80] sm:$0xff] }
  0xfe   :  { %v1482_v36 = vpack.c.bf16 %v989_v26, %v989_v26  ;;  %v987_v38 = vmax.f32 %v923_v32, 0.0  ;;  %v896_v43 = vld [vmem:[#allocation2 + $0x50] sm:$0xff]  ;;  %833 = vst.msk [vmem:[#allocation2 + $0x70] sm:$0xff] %vm16_vm0, %v768_v33  ;;  %865 = vst.msk [vmem:[#allocation2 + $0x170] sm:$0xff] %vm16_vm0, %v800_v34  ;;  %v1578_v51 = vpop.f32.mrf.mxu0  ;;  %v1610_v52 = vpop.f32.mrf.mxu1  ;;  %v129_v20 = vld [vmem:[#allocation2 + $0x180] sm:$0xff] }
  0xff   :  { %v928_v44 = vld [vmem:[#allocation2 + $0x150] sm:$0xff]  ;;  %1278 = vst.msk [vmem:[%s2276_s2 + $0x1c] sm:$0xf] %vm1270_vm1, %v1450_v35  ;;  %v1448_v47 = vpack.c.bf16 %v955_v37, %v955_v37  ;;  %v960_v49 = vmax.f32 %v896_v43, 0.0  ;;  %v769_v57 = vadd.f32 %v1578_v51, %v96_v41  ;;  %v801_v58 = vadd.f32 %v1610_v52, %v128_v42  ;;  %v100_v31 = vld [vmem:[#allocation2 + $0x98] sm:$0xff]  ;;  %v98_v43 = vld [vmem:[#allocation2 + $0x88] sm:$0xff] }
 0x100   :  { %1310 = vst.msk [vmem:[%s2276_s2 + $0x9c] sm:$0xf] %vm1270_vm1, %v1482_v36  ;;  %v1480_v48 = vpack.c.bf16 %v987_v38, %v987_v38  ;;  %v992_v50 = vmax.f32 %v928_v44, 0.0  ;;  %v894_v55 = vld [vmem:[#allocation2 + $0x40] sm:$0xff]  ;;  %v550_v63 = vpop.f32.mrf.mxu0  ;;  %v678_v0 = vpop.f32.mrf.mxu1  ;;  %v132_v32 = vld [vmem:[#allocation2 + $0x198] sm:$0xff]  ;;  %v130_v44 = vld [vmem:[#allocation2 + $0x188] sm:$0xff] }
 0x101   :  { %v926_v56 = vld [vmem:[#allocation2 + $0x140] sm:$0xff]  ;;  %831 = vst.msk [vmem:[#allocation2 + $0x60] sm:$0xff] %vm16_vm0, %v766_v45  ;;  %863 = vst.msk [vmem:[#allocation2 + $0x160] sm:$0xff] %vm16_vm0, %v798_v46  ;;  %v1453_v59 = vpack.c.bf16 %v960_v49, %v960_v49  ;;  %v958_v61 = vmax.f32 %v894_v55, 0.0  ;;  %v767_v5 = vadd.f32 %v550_v63, %v94_v53  ;;  %v799_v6 = vadd.f32 %v678_v0, %v126_v54  ;;  %v103_v55 = vld [vmem:[#allocation2 + $0xb0] sm:$0xff] }
 0x102   :  { %1276 = vst.msk [vmem:[%s2276_s2 + $0x14] sm:$0xf] %vm1270_vm1, %v1448_v47  ;;  %1308 = vst.msk [vmem:[%s2276_s2 + $0x94] sm:$0xf] %vm1270_vm1, %v1480_v48  ;;  %v1485_v60 = vpack.c.bf16 %v992_v50, %v992_v50  ;;  %v990_v62 = vmax.f32 %v926_v56, 0.0  ;;  %v897_v3 = vld [vmem:[#allocation2 + $0x58] sm:$0xff]  ;;  %v1581_v13 = vpop.f32.mrf.mxu0  ;;  %v1613_v14 = vpop.f32.mrf.mxu1 }
 0x103   :  { %v929_v4 = vld [vmem:[#allocation2 + $0x158] sm:$0xff]  ;;  %834 = vst.msk [vmem:[#allocation2 + $0x78] sm:$0xff] %vm16_vm0, %v769_v57  ;;  %866 = vst.msk [vmem:[#allocation2 + $0x178] sm:$0xff] %vm16_vm0, %v801_v58  ;;  %v1451_v7 = vpack.c.bf16 %v958_v61, %v958_v61  ;;  %v961_v9 = vmax.f32 %v897_v3, 0.0  ;;  %v772_v17 = vadd.f32 %v1581_v13, %v99_v1  ;;  %v804_v18 = vadd.f32 %v1613_v14, %v131_v2  ;;  %v135_v56 = vld [vmem:[#allocation2 + $0x1b0] sm:$0xff] }
 0x104   :  { %1281 = vst.msk [vmem:[%s2276_s2 + $0x28] sm:$0xf] %vm1270_vm1, %v1453_v59  ;;  %1313 = vst.msk [vmem:[%s2276_s2 + $0xa8] sm:$0xf] %vm1270_vm1, %v1485_v60  ;;  %v1483_v8 = vpack.c.bf16 %v990_v62, %v990_v62  ;;  %v993_v10 = vmax.f32 %v929_v4, 0.0  ;;  %v895_v11 = vld [vmem:[#allocation2 + $0x48] sm:$0xff]  ;;  %v563_v25 = vpop.f32.mrf.mxu0  ;;  %v691_v26 = vpop.f32.mrf.mxu1 }
 0x105   :  { %v927_v12 = vld [vmem:[#allocation2 + $0x148] sm:$0xff]  ;;  %v959_v15 = vmax.f32 %v895_v11, 0.0  ;;  %832 = vst.msk [vmem:[#allocation2 + $0x68] sm:$0xff] %vm16_vm0, %v767_v5  ;;  %864 = vst.msk [vmem:[#allocation2 + $0x168] sm:$0xff] %vm16_vm0, %v799_v6  ;;  %v1454_v21 = vpack.c.bf16 %v961_v9, %v961_v9  ;;  %v900_v23 = vld [vmem:[#allocation2 + $0x70] sm:$0xff]  ;;  %v770_v35 = vadd.f32 %v563_v25, %v97_v19  ;;  %v802_v36 = vadd.f32 %v691_v26, %v129_v20 }
 0x106   :  { %v991_v16 = vmax.f32 %v927_v12, 0.0  ;;  %1279 = vst.msk [vmem:[%s2276_s2 + $0x20] sm:$0xf] %vm1270_vm1, %v1451_v7  ;;  %1311 = vst.msk [vmem:[%s2276_s2 + $0xa0] sm:$0xf] %vm1270_vm1, %v1483_v8  ;;  %v1486_v22 = vpack.c.bf16 %v993_v10, %v993_v10  ;;  %v932_v24 = vld [vmem:[#allocation2 + $0x170] sm:$0xff]  ;;  %v1582_v37 = vpop.f32.mrf.mxu0  ;;  %v1614_v38 = vpop.f32.mrf.mxu1 }
 0x107   :  { %v1452_v27 = vpack.c.bf16 %v959_v15, %v959_v15  ;;  %v964_v29 = vmax.f32 %v900_v23, 0.0  ;;  %v996_v30 = vmax.f32 %v932_v24, 0.0  ;;  %837 = vst.msk [vmem:[#allocation2 + $0x90] sm:$0xff] %vm16_vm0, %v772_v17  ;;  %869 = vst.msk [vmem:[#allocation2 + $0x190] sm:$0xff] %vm16_vm0, %v804_v18  ;;  %v773_v47 = vadd.f32 %v1582_v37, %v100_v31  ;;  %v101_v3 = vld [vmem:[#allocation2 + $0xa0] sm:$0xff]  ;;  %v104_v5 = vld [vmem:[#allocation2 + $0xb8] sm:$0xff] }
 0x108   :  { %v1484_v28 = vpack.c.bf16 %v991_v16, %v991_v16  ;;  %1282 = vst.msk [vmem:[%s2276_s2 + $0x2c] sm:$0xf] %vm1270_vm1, %v1454_v21  ;;  %1314 = vst.msk [vmem:[%s2276_s2 + $0xac] sm:$0xf] %vm1270_vm1, %v1486_v22  ;;  %v898_v33 = vld [vmem:[#allocation2 + $0x60] sm:$0xff]  ;;  %v805_v48 = vadd.f32 %v1614_v38, %v132_v32  ;;  %v566_v49 = vpop.f32.mrf.mxu0  ;;  %v694_v50 = vpop.f32.mrf.mxu1  ;;  %v136_v12 = vld [vmem:[#allocation2 + $0x1b8] sm:$0xff] }
 0x109   :  { %v930_v34 = vld [vmem:[#allocation2 + $0x160] sm:$0xff]  ;;  %1280 = vst.msk [vmem:[%s2276_s2 + $0x24] sm:$0xf] %vm1270_vm1, %v1452_v27  ;;  %v1457_v39 = vpack.c.bf16 %v964_v29, %v964_v29  ;;  %v1489_v40 = vpack.c.bf16 %v996_v30, %v996_v30  ;;  %v962_v41 = vmax.f32 %v898_v33, 0.0  ;;  %v771_v59 = vadd.f32 %v566_v49, %v98_v43  ;;  %v102_v21 = vld [vmem:[#allocation2 + $0xa8] sm:$0xff]  ;;  %v107_v33 = vld [vmem:[#allocation2 + $0xd0] sm:$0xff] }
 0x10a   :  { %1312 = vst.msk [vmem:[%s2276_s2 + $0xa4] sm:$0xf] %vm1270_vm1, %v1484_v28  ;;  %v994_v42 = vmax.f32 %v930_v34, 0.0  ;;  %v901_v45 = vld [vmem:[#allocation2 + $0x78] sm:$0xff]  ;;  %v803_v60 = vadd.f32 %v694_v50, %v130_v44  ;;  %v1585_v61 = vpop.f32.mrf.mxu0  ;;  %v1617_v62 = vpop.f32.mrf.mxu1  ;;  %v133_v4 = vld [vmem:[#allocation2 + $0x1a0] sm:$0xff]  ;;  %v134_v22 = vld [vmem:[#allocation2 + $0x1a8] sm:$0xff] }
 0x10b   :  { %v933_v46 = vld [vmem:[#allocation2 + $0x178] sm:$0xff]  ;;  %835 = vst.msk [vmem:[#allocation2 + $0x80] sm:$0xff] %vm16_vm0, %v770_v35  ;;  %867 = vst.msk [vmem:[#allocation2 + $0x180] sm:$0xff] %vm16_vm0, %v802_v36  ;;  %v1455_v51 = vpack.c.bf16 %v962_v41, %v962_v41  ;;  %v965_v53 = vmax.f32 %v901_v45, 0.0  ;;  %v776_v8 = vadd.f32 %v1585_v61, %v103_v55  ;;  %v808_v9 = vadd.f32 %v1617_v62, %v135_v56  ;;  %v139_v34 = vld [vmem:[#allocation2 + $0x1d0] sm:$0xff] }
 0x10c   :  { %1285 = vst.msk [vmem:[%s2276_s2 + $0x38] sm:$0xf] %vm1270_vm1, %v1457_v39  ;;  %1317 = vst.msk [vmem:[%s2276_s2 + $0xb8] sm:$0xf] %vm1270_vm1, %v1489_v40  ;;  %v1487_v52 = vpack.c.bf16 %v994_v42, %v994_v42  ;;  %v997_v54 = vmax.f32 %v933_v46, 0.0  ;;  %v899_v57 = vld [vmem:[#allocation2 + $0x68] sm:$0xff]  ;;  %v579_v10 = vpop.f32.mrf.mxu0  ;;  %v707_v11 = vpop.f32.mrf.mxu1 }
 0x10d   :  { %v931_v58 = vld [vmem:[#allocation2 + $0x168] sm:$0xff]  ;;  %838 = vst.msk [vmem:[#allocation2 + $0x98] sm:$0xff] %vm16_vm0, %v773_v47  ;;  %870 = vst.msk [vmem:[#allocation2 + $0x198] sm:$0xff] %vm16_vm0, %v805_v48  ;;  %v1458_v63 = vpack.c.bf16 %v965_v53, %v965_v53  ;;  %v963_v1 = vmax.f32 %v899_v57, 0.0  ;;  %v774_v17 = vadd.f32 %v579_v10, %v101_v3  ;;  %v806_v18 = vadd.f32 %v707_v11, %v133_v4  ;;  %v105_v45 = vld [vmem:[#allocation2 + $0xc0] sm:$0xff] }
 0x10e   :  { %1283 = vst.msk [vmem:[%s2276_s2 + $0x30] sm:$0xf] %vm1270_vm1, %v1455_v51  ;;  %1315 = vst.msk [vmem:[%s2276_s2 + $0xb0] sm:$0xf] %vm1270_vm1, %v1487_v52  ;;  %v1490_v0 = vpack.c.bf16 %v997_v54, %v997_v54  ;;  %v995_v2 = vmax.f32 %v931_v58, 0.0  ;;  %v904_v6 = vld [vmem:[#allocation2 + $0x90] sm:$0xff]  ;;  %v1586_v19 = vpop.f32.mrf.mxu0  ;;  %v1618_v20 = vpop.f32.mrf.mxu1 }
 0x10f   :  { %v936_v7 = vld [vmem:[#allocation2 + $0x190] sm:$0xff]  ;;  %836 = vst.msk [vmem:[#allocation2 + $0x88] sm:$0xff] %vm16_vm0, %v771_v59  ;;  %868 = vst.msk [vmem:[#allocation2 + $0x188] sm:$0xff] %vm16_vm0, %v803_v60  ;;  %v1456_v13 = vpack.c.bf16 %v963_v1, %v963_v1  ;;  %v968_v15 = vmax.f32 %v904_v6, 0.0  ;;  %v777_v27 = vadd.f32 %v1586_v19, %v104_v5  ;;  %v809_v28 = vadd.f32 %v1618_v20, %v136_v12  ;;  %v137_v46 = vld [vmem:[#allocation2 + $0x1c0] sm:$0xff] }
 0x110   :  { %1286 = vst.msk [vmem:[%s2276_s2 + $0x3c] sm:$0xf] %vm1270_vm1, %v1458_v63  ;;  %1318 = vst.msk [vmem:[%s2276_s2 + $0xbc] sm:$0xf] %vm1270_vm1, %v1490_v0  ;;  %v1488_v14 = vpack.c.bf16 %v995_v2, %v995_v2  ;;  %v1000_v16 = vmax.f32 %v936_v7, 0.0  ;;  %v582_v31 = vpop.f32.mrf.mxu0  ;;  %v710_v32 = vpop.f32.mrf.mxu1  ;;  %v108_v57 = vld [vmem:[#allocation2 + $0xd8] sm:$0xff] }
 0x111   :  { %841 = vst.msk [vmem:[#allocation2 + $0xb0] sm:$0xff] %vm16_vm0, %v776_v8  ;;  %873 = vst.msk [vmem:[#allocation2 + $0x1b0] sm:$0xff] %vm16_vm0, %v808_v9  ;;  %v1461_v23 = vpack.c.bf16 %v968_v15, %v968_v15  ;;  %v775_v37 = vadd.f32 %v582_v31, %v102_v21  ;;  %v807_v38 = vadd.f32 %v710_v32, %v134_v22  ;;  %v140_v58 = vld [vmem:[#allocation2 + $0x1d8] sm:$0xff]  ;;  %v106_v5 = vld [vmem:[#allocation2 + $0xc8] sm:$0xff] }
 0x112   :  { %1284 = vst.msk [vmem:[%s2276_s2 + $0x34] sm:$0xf] %vm1270_vm1, %v1456_v13  ;;  %1316 = vst.msk [vmem:[%s2276_s2 + $0xb4] sm:$0xf] %vm1270_vm1, %v1488_v14  ;;  %v1493_v24 = vpack.c.bf16 %v1000_v16, %v1000_v16  ;;  %v902_v25 = vld [vmem:[#allocation2 + $0x80] sm:$0xff]  ;;  %v1589_v43 = vpop.f32.mrf.mxu0  ;;  %v1621_v44 = vpop.f32.mrf.mxu1  ;;  %v138_v6 = vld [vmem:[#allocation2 + $0x1c8] sm:$0xff] }
 0x113   :  { %v934_v26 = vld [vmem:[#allocation2 + $0x180] sm:$0xff]  ;;  %v966_v29 = vmax.f32 %v902_v25, 0.0  ;;  %839 = vst.msk [vmem:[#allocation2 + $0xa0] sm:$0xff] %vm16_vm0, %v774_v17  ;;  %871 = vst.msk [vmem:[#allocation2 + $0x1a0] sm:$0xff] %vm16_vm0, %v806_v18  ;;  %v780_v49 = vadd.f32 %v1589_v43, %v107_v33  ;;  %v812_v50 = vadd.f32 %v1621_v44, %v139_v34 }
 0x114   :  { %v998_v30 = vmax.f32 %v934_v26, 0.0  ;;  %1289 = vst.msk [vmem:[%s2276_s2 + $0x48] sm:$0xf] %vm1270_vm1, %v1461_v23  ;;  %1321 = vst.msk [vmem:[%s2276_s2 + $0xc8] sm:$0xf] %vm1270_vm1, %v1493_v24  ;;  %v905_v35 = vld [vmem:[#allocation2 + $0x98] sm:$0xff]  ;;  %v595_v55 = vpop.f32.mrf.mxu0  ;;  %v723_v56 = vpop.f32.mrf.mxu1 }
 0x115   :  { %v937_v36 = vld [vmem:[#allocation2 + $0x198] sm:$0xff]  ;;  %842 = vst.msk [vmem:[#allocation2 + $0xb8] sm:$0xff] %vm16_vm0, %v777_v27  ;;  %874 = vst.msk [vmem:[#allocation2 + $0x1b8] sm:$0xff] %vm16_vm0, %v809_v28  ;;  %v1459_v39 = vpack.c.bf16 %v966_v29, %v966_v29  ;;  %v969_v41 = vmax.f32 %v905_v35, 0.0  ;;  %v778_v61 = vadd.f32 %v595_v55, %v105_v45  ;;  %v810_v62 = vadd.f32 %v723_v56, %v137_v46  ;;  %v111_v23 = vld [vmem:[#allocation2 + $0xf0] sm:$0xff] }
 0x116   :  { %v1491_v40 = vpack.c.bf16 %v998_v30, %v998_v30  ;;  %v1001_v42 = vmax.f32 %v937_v36, 0.0  ;;  %v903_v47 = vld [vmem:[#allocation2 + $0x88] sm:$0xff]  ;;  %840 = vst.msk [vmem:[#allocation2 + $0xa8] sm:$0xff] %vm16_vm0, %v775_v37  ;;  %872 = vst.msk [vmem:[#allocation2 + $0x1a8] sm:$0xff] %vm16_vm0, %v807_v38  ;;  %v1590_v3 = vpop.f32.mrf.mxu0  ;;  %v1622_v4 = vpop.f32.mrf.mxu1  ;;  %v143_v24 = vld [vmem:[#allocation2 + $0x1f0] sm:$0xff] }
 0x117   :  { %v935_v48 = vld [vmem:[#allocation2 + $0x188] sm:$0xff]  ;;  %1287 = vst.msk [vmem:[%s2276_s2 + $0x40] sm:$0xf] %vm1270_vm1, %v1459_v39  ;;  %v1462_v51 = vpack.c.bf16 %v969_v41, %v969_v41  ;;  %v967_v53 = vmax.f32 %v903_v47, 0.0  ;;  %v781_v9 = vadd.f32 %v1590_v3, %v108_v57  ;;  %v813_v10 = vadd.f32 %v1622_v4, %v140_v58  ;;  %v109_v35 = vld [vmem:[#allocation2 + $0xe0] sm:$0xff]  ;;  %v112_v47 = vld [vmem:[#allocation2 + $0xf8] sm:$0xff] }
 0x118   :  { %1319 = vst.msk [vmem:[%s2276_s2 + $0xc0] sm:$0xf] %vm1270_vm1, %v1491_v40  ;;  %v1494_v52 = vpack.c.bf16 %v1001_v42, %v1001_v42  ;;  %v999_v54 = vmax.f32 %v935_v48, 0.0  ;;  %v908_v59 = vld [vmem:[#allocation2 + $0xb0] sm:$0xff]  ;;  %v598_v17 = vpop.f32.mrf.mxu0  ;;  %v726_v18 = vpop.f32.mrf.mxu1  ;;  %v141_v36 = vld [vmem:[#allocation2 + $0x1e0] sm:$0xff]  ;;  %v144_v48 = vld [vmem:[#allocation2 + $0x1f8] sm:$0xff] }
 0x119   :  { %v940_v60 = vld [vmem:[#allocation2 + $0x1b0] sm:$0xff]  ;;  %845 = vst.msk [vmem:[#allocation2 + $0xd0] sm:$0xff] %vm16_vm0, %v780_v49  ;;  %877 = vst.msk [vmem:[#allocation2 + $0x1d0] sm:$0xff] %vm16_vm0, %v812_v50  ;;  %v1460_v63 = vpack.c.bf16 %v967_v53, %v967_v53  ;;  %v972_v1 = vmax.f32 %v908_v59, 0.0  ;;  %v779_v21 = vadd.f32 %v598_v17, %v106_v5  ;;  %v811_v22 = vadd.f32 %v726_v18, %v138_v6  ;;  %v110_v59 = vld [vmem:[#allocation2 + $0xe8] sm:$0xff] }
 0x11a   :  { %1290 = vst.msk [vmem:[%s2276_s2 + $0x4c] sm:$0xf] %vm1270_vm1, %v1462_v51  ;;  %1322 = vst.msk [vmem:[%s2276_s2 + $0xcc] sm:$0xf] %vm1270_vm1, %v1494_v52  ;;  %v1492_v0 = vpack.c.bf16 %v999_v54, %v999_v54  ;;  %v1004_v2 = vmax.f32 %v940_v60, 0.0  ;;  %v906_v7 = vld [vmem:[#allocation2 + $0xa0] sm:$0xff]  ;;  %v1593_v29 = vpop.f32.mrf.mxu0  ;;  %v1625_v30 = vpop.f32.mrf.mxu1 }
 0x11b   :  { %v938_v8 = vld [vmem:[#allocation2 + $0x1a0] sm:$0xff]  ;;  %843 = vst.msk [vmem:[#allocation2 + $0xc0] sm:$0xff] %vm16_vm0, %v778_v61  ;;  %875 = vst.msk [vmem:[#allocation2 + $0x1c0] sm:$0xff] %vm16_vm0, %v810_v62  ;;  %v1465_v11 = vpack.c.bf16 %v972_v1, %v972_v1  ;;  %v970_v13 = vmax.f32 %v906_v7, 0.0  ;;  %v784_v39 = vadd.f32 %v1593_v29, %v111_v23  ;;  %v816_v40 = vadd.f32 %v1625_v30, %v143_v24  ;;  %v142_v60 = vld [vmem:[#allocation2 + $0x1e8] sm:$0xff] }
 0x11c   :  { %1288 = vst.msk [vmem:[%s2276_s2 + $0x44] sm:$0xf] %vm1270_vm1, %v1460_v63  ;;  %1320 = vst.msk [vmem:[%s2276_s2 + $0xc4] sm:$0xf] %vm1270_vm1, %v1492_v0  ;;  %v1497_v12 = vpack.c.bf16 %v1004_v2, %v1004_v2  ;;  %v1002_v14 = vmax.f32 %v938_v8, 0.0  ;;  %v909_v15 = vld [vmem:[#allocation2 + $0xb8] sm:$0xff]  ;;  %v611_v41 = vpop.f32.mrf.mxu0  ;;  %v739_v42 = vpop.f32.mrf.mxu1 }
 0x11d   :  { %v941_v16 = vld [vmem:[#allocation2 + $0x1b8] sm:$0xff]  ;;  %v973_v19 = vmax.f32 %v909_v15, 0.0  ;;  %846 = vst.msk [vmem:[#allocation2 + $0xd8] sm:$0xff] %vm16_vm0, %v781_v9  ;;  %878 = vst.msk [vmem:[#allocation2 + $0x1d8] sm:$0xff] %vm16_vm0, %v813_v10  ;;  %v1463_v25 = vpack.c.bf16 %v970_v13, %v970_v13  ;;  %v907_v27 = vld [vmem:[#allocation2 + $0xa8] sm:$0xff]  ;;  %v782_v51 = vadd.f32 %v611_v41, %v109_v35  ;;  %v814_v52 = vadd.f32 %v739_v42, %v141_v36 }
 0x11e   :  { %v1005_v20 = vmax.f32 %v941_v16, 0.0  ;;  %1293 = vst.msk [vmem:[%s2276_s2 + $0x58] sm:$0xf] %vm1270_vm1, %v1465_v11  ;;  %1325 = vst.msk [vmem:[%s2276_s2 + $0xd8] sm:$0xf] %vm1270_vm1, %v1497_v12  ;;  %v1495_v26 = vpack.c.bf16 %v1002_v14, %v1002_v14  ;;  %v939_v28 = vld [vmem:[#allocation2 + $0x1a8] sm:$0xff]  ;;  %v1594_v53 = vpop.f32.mrf.mxu0  ;;  %v1626_v54 = vpop.f32.mrf.mxu1 }
 0x11f   :  { %v1466_v31 = vpack.c.bf16 %v973_v19, %v973_v19  ;;  %v971_v33 = vmax.f32 %v907_v27, 0.0  ;;  %v1003_v34 = vmax.f32 %v939_v28, 0.0  ;;  %844 = vst.msk [vmem:[#allocation2 + $0xc8] sm:$0xff] %vm16_vm0, %v779_v21  ;;  %876 = vst.msk [vmem:[#allocation2 + $0x1c8] sm:$0xff] %vm16_vm0, %v811_v22  ;;  %v785_v63 = vadd.f32 %v1594_v53, %v112_v47 }
 0x120   :  { %v1498_v32 = vpack.c.bf16 %v1005_v20, %v1005_v20  ;;  %1291 = vst.msk [vmem:[%s2276_s2 + $0x50] sm:$0xf] %vm1270_vm1, %v1463_v25  ;;  %1323 = vst.msk [vmem:[%s2276_s2 + $0xd0] sm:$0xf] %vm1270_vm1, %v1495_v26  ;;  %v912_v37 = vld [vmem:[#allocation2 + $0xd0] sm:$0xff]  ;;  %v817_v0 = vadd.f32 %v1626_v54, %v144_v48  ;;  %v614_v1 = vpop.f32.mrf.mxu0  ;;  %v742_v2 = vpop.f32.mrf.mxu1 }
 0x121   :  { %v944_v38 = vld [vmem:[#allocation2 + $0x1d0] sm:$0xff]  ;;  %1294 = vst.msk [vmem:[%s2276_s2 + $0x5c] sm:$0xf] %vm1270_vm1, %v1466_v31  ;;  %v1464_v43 = vpack.c.bf16 %v971_v33, %v971_v33  ;;  %v1496_v44 = vpack.c.bf16 %v1003_v34, %v1003_v34  ;;  %v976_v45 = vmax.f32 %v912_v37, 0.0  ;;  %v783_v9 = vadd.f32 %v614_v1, %v110_v59 }
 0x122   :  { %1326 = vst.msk [vmem:[%s2276_s2 + $0xdc] sm:$0xf] %vm1270_vm1, %v1498_v32  ;;  %v1008_v46 = vmax.f32 %v944_v38, 0.0  ;;  %v910_v49 = vld [vmem:[#allocation2 + $0xc0] sm:$0xff]  ;;  %v815_v10 = vadd.f32 %v742_v2, %v142_v60 }
 0x123   :  { %v942_v50 = vld [vmem:[#allocation2 + $0x1c0] sm:$0xff]  ;;  %849 = vst.msk [vmem:[#allocation2 + $0xf0] sm:$0xff] %vm16_vm0, %v784_v39  ;;  %881 = vst.msk [vmem:[#allocation2 + $0x1f0] sm:$0xff] %vm16_vm0, %v816_v40  ;;  %v1469_v55 = vpack.c.bf16 %v976_v45, %v976_v45  ;;  %v974_v57 = vmax.f32 %v910_v49, 0.0 }
 0x124   :  { %1292 = vst.msk [vmem:[%s2276_s2 + $0x54] sm:$0xf] %vm1270_vm1, %v1464_v43  ;;  %1324 = vst.msk [vmem:[%s2276_s2 + $0xd4] sm:$0xf] %vm1270_vm1, %v1496_v44  ;;  %v1501_v56 = vpack.c.bf16 %v1008_v46, %v1008_v46  ;;  %v1006_v58 = vmax.f32 %v942_v50, 0.0  ;;  %v913_v61 = vld [vmem:[#allocation2 + $0xd8] sm:$0xff] }
 0x125   :  { %v945_v62 = vld [vmem:[#allocation2 + $0x1d8] sm:$0xff]  ;;  %847 = vst.msk [vmem:[#allocation2 + $0xe0] sm:$0xff] %vm16_vm0, %v782_v51  ;;  %879 = vst.msk [vmem:[#allocation2 + $0x1e0] sm:$0xff] %vm16_vm0, %v814_v52  ;;  %v1467_v3 = vpack.c.bf16 %v974_v57, %v974_v57  ;;  %v977_v5 = vmax.f32 %v913_v61, 0.0 }
 0x126   :  { %1297 = vst.msk [vmem:[%s2276_s2 + $0x68] sm:$0xf] %vm1270_vm1, %v1469_v55  ;;  %1329 = vst.msk [vmem:[%s2276_s2 + $0xe8] sm:$0xf] %vm1270_vm1, %v1501_v56  ;;  %v1499_v4 = vpack.c.bf16 %v1006_v58, %v1006_v58  ;;  %v1009_v6 = vmax.f32 %v945_v62, 0.0  ;;  %v911_v7 = vld [vmem:[#allocation2 + $0xc8] sm:$0xff] }
 0x127   :  { %v943_v8 = vld [vmem:[#allocation2 + $0x1c8] sm:$0xff]  ;;  %850 = vst.msk [vmem:[#allocation2 + $0xf8] sm:$0xff] %vm16_vm0, %v785_v63  ;;  %882 = vst.msk [vmem:[#allocation2 + $0x1f8] sm:$0xff] %vm16_vm0, %v817_v0  ;;  %v1470_v11 = vpack.c.bf16 %v977_v5, %v977_v5  ;;  %v975_v13 = vmax.f32 %v911_v7, 0.0 }
 0x128   :  { %1295 = vst.msk [vmem:[%s2276_s2 + $0x60] sm:$0xf] %vm1270_vm1, %v1467_v3  ;;  %1327 = vst.msk [vmem:[%s2276_s2 + $0xe0] sm:$0xf] %vm1270_vm1, %v1499_v4  ;;  %v1502_v12 = vpack.c.bf16 %v1009_v6, %v1009_v6  ;;  %v1007_v14 = vmax.f32 %v943_v8, 0.0 }
 0x129   :  { %848 = vst.msk [vmem:[#allocation2 + $0xe8] sm:$0xff] %vm16_vm0, %v783_v9  ;;  %880 = vst.msk [vmem:[#allocation2 + $0x1e8] sm:$0xff] %vm16_vm0, %v815_v10  ;;  %v1468_v15 = vpack.c.bf16 %v975_v13, %v975_v13 }
 0x12a   :  { %1298 = vst.msk [vmem:[%s2276_s2 + $0x6c] sm:$0xf] %vm1270_vm1, %v1470_v11  ;;  %1330 = vst.msk [vmem:[%s2276_s2 + $0xec] sm:$0xf] %vm1270_vm1, %v1502_v12  ;;  %v1500_v16 = vpack.c.bf16 %v1007_v14, %v1007_v14  ;;  %v916_v17 = vld [vmem:[#allocation2 + $0xf0] sm:$0xff] }
 0x12b   :  { %v948_v18 = vld [vmem:[#allocation2 + $0x1f0] sm:$0xff]  ;;  %v980_v19 = vmax.f32 %v916_v17, 0.0  ;;  %1296 = vst.msk [vmem:[%s2276_s2 + $0x64] sm:$0xf] %vm1270_vm1, %v1468_v15 }
 0x12c   :  { %v1012_v20 = vmax.f32 %v948_v18, 0.0  ;;  %1328 = vst.msk [vmem:[%s2276_s2 + $0xe4] sm:$0xf] %vm1270_vm1, %v1500_v16  ;;  %v914_v21 = vld [vmem:[#allocation2 + $0xe0] sm:$0xff] }
 0x12d   :  { %v946_v22 = vld [vmem:[#allocation2 + $0x1e0] sm:$0xff]  ;;  %v1473_v23 = vpack.c.bf16 %v980_v19, %v980_v19  ;;  %v978_v25 = vmax.f32 %v914_v21, 0.0 }
 0x12e   :  { %v1505_v24 = vpack.c.bf16 %v1012_v20, %v1012_v20  ;;  %v1010_v26 = vmax.f32 %v946_v22, 0.0  ;;  %v917_v27 = vld [vmem:[#allocation2 + $0xf8] sm:$0xff] }
 0x12f   :  { %v949_v28 = vld [vmem:[#allocation2 + $0x1f8] sm:$0xff]  ;;  %1301 = vst.msk [vmem:[%s2276_s2 + $0x78] sm:$0xf] %vm1270_vm1, %v1473_v23  ;;  %v1471_v29 = vpack.c.bf16 %v978_v25, %v978_v25  ;;  %v981_v31 = vmax.f32 %v917_v27, 0.0 }
 0x130   :  { %1333 = vst.msk [vmem:[%s2276_s2 + $0xf8] sm:$0xf] %vm1270_vm1, %v1505_v24  ;;  %v1503_v30 = vpack.c.bf16 %v1010_v26, %v1010_v26  ;;  %v1013_v32 = vmax.f32 %v949_v28, 0.0  ;;  %v915_v33 = vld [vmem:[#allocation2 + $0xe8] sm:$0xff] }
 0x131   :  { %v947_v34 = vld [vmem:[#allocation2 + $0x1e8] sm:$0xff]  ;;  %1299 = vst.msk [vmem:[%s2276_s2 + $0x70] sm:$0xf] %vm1270_vm1, %v1471_v29  ;;  %v1474_v35 = vpack.c.bf16 %v981_v31, %v981_v31  ;;  %v979_v37 = vmax.f32 %v915_v33, 0.0 }
 0x132   :  { %1331 = vst.msk [vmem:[%s2276_s2 + $0xf0] sm:$0xf] %vm1270_vm1, %v1503_v30  ;;  %v1506_v36 = vpack.c.bf16 %v1013_v32, %v1013_v32  ;;  %v1011_v38 = vmax.f32 %v947_v34, 0.0 }
 0x133   :  { %1302 = vst.msk [vmem:[%s2276_s2 + $0x7c] sm:$0xf] %vm1270_vm1, %v1474_v35  ;;  %v1472_v39 = vpack.c.bf16 %v979_v37, %v979_v37 }
 0x134   :  { %1334 = vst.msk [vmem:[%s2276_s2 + $0xfc] sm:$0xf] %vm1270_vm1, %v1506_v36  ;;  %v1504_v40 = vpack.c.bf16 %v1011_v38, %v1011_v38 }
 0x135   :  { %1300 = vst.msk [vmem:[%s2276_s2 + $0x74] sm:$0xf] %vm1270_vm1, %v1472_v39 }
 0x136   :  { %1332 = vst.msk [vmem:[%s2276_s2 + $0xf4] sm:$0xf] %vm1270_vm1, %v1504_v40 }

</bundles_post_ra>
